<compile_context>
chip_gen: v7x
topology: tpu7x:2x2x1
jax: 0.10.0
libtpu: 0.0.40
codegen_flags: <defaults>
</compile_context>

<pallas_src>
import functools

import jax
import jax.numpy as jnp
from jax import lax
from jax.experimental import pallas as pl
from jax.experimental.pallas import tpu as pltpu


def _cfconv_kernel(x_ref, w1_ref, b1_ref, wcf_ref, bcf_ref, out_ref, hpad_ref,
                   *, Nb, CH, H, W, Cin, Cout, fh, fw, rh, rw, Ho, Wo):
    Hp = H + 2 * rh
    nchunks = Nb // CH

    # ---- zero only the top/bottom halo rows (full-width, lane offset 0) ----
    # Interior rows are fully overwritten by every chunk below.
    if rh > 0:
        hpad_ref[:, :, 0:rh, :] = jnp.zeros((CH, Cout, rh, W), jnp.float32)
        hpad_ref[:, :, Hp - rh:Hp, :] = jnp.zeros((CH, Cout, rh, W), jnp.float32)

    def shifted(a, s):
        """v[..., j] = a[..., j + s] if 0 <= j + s < W else 0 ; width Wo."""
        lo = max(0, -s)
        hi = min(Wo, W - s)
        if hi <= lo:
            return None                         # tap never hits a valid column
        if lo == 0 and hi == Wo:                # s >= 0 and s + Wo <= W
            return a[:, :, s:s + Wo]            # (free when s == 0)
        parts = []
        if lo > 0:
            parts.append(jnp.zeros((CH, Ho, lo), jnp.float32))
        parts.append(a[:, :, lo + s:hi + s])
        if hi < Wo:
            parts.append(jnp.zeros((CH, Ho, Wo - hi), jnp.float32))
        return jnp.concatenate(parts, axis=-1)

    def chunk_body(c, carry):
        start = c * CH
        if not isinstance(start, int):
            start = pl.multiple_of(start, CH)

        # ---- conv1 (1x1) + bias, vectorized over the CH-item chunk --------
        # channel-major scalar-broadcast FMAs on the VPU (SMEM scalar weights);
        # full-width, lane-offset-0 stores into the row-padded scratch.
        x_chunk = x_ref[pl.ds(start, CH)]                    # (CH, Cin, H, W)
        for co in range(Cout):
            h_co = x_chunk[:, 0] * w1_ref[co * Cin] + b1_ref[co]
            for ci in range(1, Cin):
                h_co = h_co + w1_ref[co * Cin + ci] * x_chunk[:, ci]
            hpad_ref[:, co, rh:rh + H, :] = h_co             # (CH, H, W)

        # ---- cf conv: ref-sliced rows (sublane offsets only), deferred dx --
        accs = [jnp.zeros((CH, Ho, W), jnp.float32) for _ in range(fw)]
        for co in range(Cout):
            for dy in range(fh):
                row = hpad_ref[:, co, dy:dy + Ho, :]         # (CH, Ho, W)
                for dx in range(fw):
                    accs[dx] = accs[dx] + wcf_ref[(co * fh + dy) * fw + dx] * row

        # ---- combine: only (fw-1) lane realignments; cf bias folded in -----
        res = None
        for dx in range(fw):
            contrib = shifted(accs[dx], dx - rw)
            if contrib is None:
                continue
            if res is None:
                res = contrib + bcf_ref[0]
            else:
                res = res + contrib
        if res is None:
            res = jnp.zeros((CH, Ho, Wo), jnp.float32) + bcf_ref[0]

        out_ref[pl.ds(start, CH)] = res.astype(out_ref.dtype)
        return carry

    if nchunks == 1:
        chunk_body(0, 0)
    else:
        lax.fori_loop(0, nchunks, chunk_body, 0, unroll=2)


def _vmem_budget_bytes():
    """Generation-aware VMEM budget for the batch block (conservative)."""
    try:
        cap = pltpu.get_tpu_info().vmem_capacity_bytes  # 128 MiB v5e/v6e, 64 MiB v7x
    except Exception:
        cap = 64 * 1024 * 1024
    return max(8 * 1024 * 1024, cap // 4)


def _pick_batch_block(N, Cin, H, W, Ho, Wo, chunk):
    """Batch items per grid step: fits the VMEM budget, keeps >= ~4 grid steps
    (so v7x's two cores both get work on the 'parallel' axis), caps at 64
    (per-step overhead already <5%), and stays a multiple of the chunk size."""
    def padded_plane(r, c):   # (8,128)-tile-padded footprint of a 2-D f32 plane
        return (-(-r // 8) * 8) * (-(-c // 128) * 128) * 4
    per_item = (2 * Cin * padded_plane(H, W)      # x block, double-buffered
                + 2 * padded_plane(Ho, Wo))       # out block, double-buffered
    nb = max(1, _vmem_budget_bytes() // max(per_item, 1))
    nb = min(nb, 64)
    nb = min(nb, max(1, N // 4))
    if nb >= chunk:
        nb -= nb % chunk                          # keep the in-kernel chunk loop exact
    return max(1, nb)


def cfconv1net_online(x_nchw, w1, b1, wcf, bcf, *, fh, fw, rh, rw):
    """Forward pass of CFConv1NetOnline. x_nchw: (N, Cin, H, W) float32.

    Returns (N, 1, Ho, Wo) with Ho = H + 2*rh - fh + 1, Wo = W + 2*rw - fw + 1,
    matching nn.Conv2d semantics (conv1 + bias -> zero pad -> cf conv + bias).
    """
    N, Cin, H, W = x_nchw.shape
    Cout = w1.shape[0]
    Ho = H + 2 * rh - fh + 1
    Wo = W + 2 * rw - fw + 1
    Hp = H + 2 * rh

    CHUNK = 4                                      # nb-vectorization width in-kernel
    Nb = _pick_batch_block(N, Cin, H, W, Ho, Wo, CHUNK)
    CH = min(CHUNK, Nb)                            # Nb is a multiple of CH by construction

    # Pad the batch instead of collapsing Nb for awkward N; slice afterwards.
    Np = -(-N // Nb) * Nb
    x_in = x_nchw.astype(jnp.float32)
    if Np != N:
        x_in = jnp.concatenate(
            [x_in, jnp.zeros((Np - N, Cin, H, W), jnp.float32)], axis=0)

    # All parameters become flat 1-D SMEM scalar tables (free reshapes).
    w1_flat = w1.reshape(Cout * Cin).astype(jnp.float32)        # [co*Cin + ci]
    b1_flat = b1.reshape(Cout).astype(jnp.float32)
    wcf_flat = wcf.reshape(Cout * fh * fw).astype(jnp.float32)  # [(co*fh+dy)*fw+dx]
    bcf_flat = bcf.reshape(1).astype(jnp.float32)

    kernel = functools.partial(
        _cfconv_kernel, Nb=Nb, CH=CH, H=H, W=W, Cin=Cin, Cout=Cout,
        fh=fh, fw=fw, rh=rh, rw=rw, Ho=Ho, Wo=Wo)

    smem_spec = pl.BlockSpec(memory_space=pltpu.MemorySpace.SMEM)

    out = pl.pallas_call(
        kernel,
        out_shape=jax.ShapeDtypeStruct((Np, Ho, Wo), jnp.float32),
        grid_spec=pltpu.PrefetchScalarGridSpec(
            num_scalar_prefetch=0,
            grid=(Np // Nb,),
            in_specs=[
                pl.BlockSpec((Nb, Cin, H, W), lambda n: (n, 0, 0, 0)),
                smem_spec,   # w1  (Cout*Cin,)
                smem_spec,   # b1  (Cout,)
                smem_spec,   # wcf (Cout*fh*fw,)
                smem_spec,   # bcf (1,)
            ],
            out_specs=pl.BlockSpec((Nb, Ho, Wo), lambda n: (n, 0, 0)),
            # Row-padded (no W padding) per-chunk scratch, reused across chunks.
            scratch_shapes=[pltpu.VMEM((CH, Cout, Hp, W), jnp.float32)],
        ),
        compiler_params=pltpu.CompilerParams(
            dimension_semantics=("parallel",),     # batch axis: megacore-shardable
            vmem_limit_bytes=32 * 1024 * 1024,
        ),
    )(x_in, w1_flat, b1_flat, wcf_flat, bcf_flat)

    return out[:N].reshape(N, 1, Ho, Wo)           # free reshape in the wrapper


def _reference(x, w1, b1, wcf, bcf, rh, rw):
    """Pure-JAX reference mirroring the PyTorch module (validation only)."""
    h = jax.lax.conv_general_dilated(
        x, w1, window_strides=(1, 1), padding="VALID",
        dimension_numbers=("NCHW", "OIHW", "NCHW"))
    h = h + b1.reshape(1, -1, 1, 1)
    o = jax.lax.conv_general_dilated(
        h, wcf, window_strides=(1, 1), padding=[(rh, rh), (rw, rw)],
        dimension_numbers=("NCHW", "OIHW", "NCHW"))
    return o + bcf.reshape(1, 1, 1, 1)


if __name__ == "__main__":
    # Small shapes consistent with the module (correlation-filter style).
    N, Cin, Cout = 2, 4, 8
    H = W = 16
    fh = fw = 3
    rh = rw = 1

    key = jax.random.PRNGKey(0)
    k1, k2, k3, k4, k5, k6 = jax.random.split(key, 6)

    # Deterministic, PyTorch-style uniform init (bound = 1/sqrt(fan_in)).
    bound1 = 1.0 / (Cin ** 0.5)
    w1 = jax.random.uniform(k1, (Cout, Cin, 1, 1), jnp.float32, -bound1, bound1)
    b1 = jax.random.uniform(k2, (Cout,), jnp.float32, -bound1, bound1)
    bound2 = 1.0 / ((Cout * fh * fw) ** 0.5)
    wcf = jax.random.uniform(k3, (1, Cout, fh, fw), jnp.float32, -bound2, bound2)
    bcf = jax.random.uniform(k4, (1,), jnp.float32, -bound2, bound2)

    x = jax.random.normal(k5, (N, Cin, H, W), jnp.float32)

    out = cfconv1net_online(x, w1, b1, wcf, bcf, fh=fh, fw=fw, rh=rh, rw=rw)
    out = jax.block_until_ready(out)
    ref = jax.block_until_ready(_reference(x, w1, b1, wcf, bcf, rh, rw))
    assert out.shape == ref.shape == (N, 1, H + 2 * rh - fh + 1, W + 2 * rw - fw + 1)
    assert jnp.allclose(out, ref, atol=1e-4, rtol=1e-4), "mismatch vs JAX reference"

    # Second check: awkward batch size (exercises the wrapper batch padding,
    # the in-kernel multi-chunk fori_loop path, and a multi-step grid).
    N2 = 37
    x2 = jax.random.normal(k6, (N2, Cin, H, W), jnp.float32)
    out2 = jax.block_until_ready(
        cfconv1net_online(x2, w1, b1, wcf, bcf, fh=fh, fw=fw, rh=rh, rw=rw))
    ref2 = jax.block_until_ready(_reference(x2, w1, b1, wcf, bcf, rh, rw))
    assert out2.shape == ref2.shape == (N2, 1, H + 2 * rh - fh + 1, W + 2 * rw - fw + 1)
    assert jnp.allclose(out2, ref2, atol=1e-4, rtol=1e-4), "mismatch (awkward batch)"

    print("KERNEL_OK")
</pallas_src>

<mosaic_0001>
module attributes {stable_mosaic.version = 11 : i64} {
  func.func @_cfconv_kernel(%arg0: i32, %arg1: memref<1x4x16x16xf32, #tpu.memory_space<vmem>>, %arg2: memref<32xf32, #tpu.memory_space<smem>>, %arg3: memref<8xf32, #tpu.memory_space<smem>>, %arg4: memref<72xf32, #tpu.memory_space<smem>>, %arg5: memref<1xf32, #tpu.memory_space<smem>>, %arg6: memref<1x16x16xf32, #tpu.memory_space<vmem>>, %arg7: memref<1x8x18x16xf32, #tpu.memory_space<vmem>>) attributes {dimension_semantics = [#tpu.dimension_semantics<parallel>], iteration_bounds = array<i64: 2>, scalar_prefetch = 0 : i64, scratch_operands = 1 : i64, tpu.core_type = #tpu.core_type<tc>, window_params = [{transform_indices = @transform_0, window_bounds = array<i64: 1, 4, 16, 16>}, {transform_indices = @transform_1, window_bounds = array<i64: 32>}, {transform_indices = @transform_2, window_bounds = array<i64: 8>}, {transform_indices = @transform_3, window_bounds = array<i64: 72>}, {transform_indices = @transform_4, window_bounds = array<i64: 1>}, {transform_indices = @transform_5, window_bounds = array<i64: 1, 16, 16>}]} {
    %cst = arith.constant 0.000000e+00 : f32
    %0 = vector.broadcast %cst : f32 to vector<1x8x1x16xf32>
    %c0 = arith.constant 0 : index
    %c0_0 = arith.constant 0 : index
    %c0_1 = arith.constant 0 : index
    %c0_2 = arith.constant 0 : index
    %1 = vector.load %arg7[%c0, %c0_0, %c0_1, %c0_2] : memref<1x8x18x16xf32, #tpu.memory_space<vmem>>, vector<1x8x1x16xf32>
    tpu.vector_store %arg7[%c0, %c0_0, %c0_1, %c0_2], %0 {strides = array<i32>} : memref<1x8x18x16xf32, #tpu.memory_space<vmem>>, vector<1x8x1x16xf32>,
    %cst_3 = arith.constant 0.000000e+00 : f32
    %2 = vector.broadcast %cst_3 : f32 to vector<1x8x1x16xf32>
    %c0_4 = arith.constant 0 : index
    %c0_5 = arith.constant 0 : index
    %c17 = arith.constant 17 : index
    %c0_6 = arith.constant 0 : index
    %3 = vector.load %arg7[%c0_4, %c0_5, %c17, %c0_6] : memref<1x8x18x16xf32, #tpu.memory_space<vmem>>, vector<1x8x1x16xf32>
    tpu.vector_store %arg7[%c0_4, %c0_5, %c17, %c0_6], %2 {strides = array<i32>} : memref<1x8x18x16xf32, #tpu.memory_space<vmem>>, vector<1x8x1x16xf32>,
    %c0_7 = arith.constant 0 : index
    %c0_8 = arith.constant 0 : index
    %c0_9 = arith.constant 0 : index
    %c0_10 = arith.constant 0 : index
    %4 = vector.load %arg1[%c0_7, %c0_8, %c0_9, %c0_10] : memref<1x4x16x16xf32, #tpu.memory_space<vmem>>, vector<1x4x16x16xf32>
    %5 = vector.extract_strided_slice %4 {offsets = [0, 0, 0, 0], sizes = [1, 1, 16, 16], strides = [1, 1, 1, 1]} : vector<1x4x16x16xf32> to vector<1x1x16x16xf32>
    %6 = vector.shape_cast %5 : vector<1x1x16x16xf32> to vector<1x16x16xf32>
    %c0_11 = arith.constant 0 : index
    %7 = memref.load %arg2[%c0_11] : memref<32xf32, #tpu.memory_space<smem>>
    %8 = vector.broadcast %7 : f32 to vector<1x16x16xf32>
    %9 = arith.mulf %6, %8 : vector<1x16x16xf32>
    %c0_12 = arith.constant 0 : index
    %10 = memref.load %arg3[%c0_12] : memref<8xf32, #tpu.memory_space<smem>>
    %11 = vector.broadcast %10 : f32 to vector<1x16x16xf32>
    %12 = arith.addf %9, %11 : vector<1x16x16xf32>
    %c1 = arith.constant 1 : index
    %13 = memref.load %arg2[%c1] : memref<32xf32, #tpu.memory_space<smem>>
    %14 = vector.extract_strided_slice %4 {offsets = [0, 1, 0, 0], sizes = [1, 1, 16, 16], strides = [1, 1, 1, 1]} : vector<1x4x16x16xf32> to vector<1x1x16x16xf32>
    %15 = vector.shape_cast %14 : vector<1x1x16x16xf32> to vector<1x16x16xf32>
    %16 = vector.broadcast %13 : f32 to vector<1x16x16xf32>
    %17 = arith.mulf %16, %15 : vector<1x16x16xf32>
    %18 = arith.addf %12, %17 : vector<1x16x16xf32>
    %c2 = arith.constant 2 : index
    %19 = memref.load %arg2[%c2] : memref<32xf32, #tpu.memory_space<smem>>
    %20 = vector.extract_strided_slice %4 {offsets = [0, 2, 0, 0], sizes = [1, 1, 16, 16], strides = [1, 1, 1, 1]} : vector<1x4x16x16xf32> to vector<1x1x16x16xf32>
    %21 = vector.shape_cast %20 : vector<1x1x16x16xf32> to vector<1x16x16xf32>
    %22 = vector.broadcast %19 : f32 to vector<1x16x16xf32>
    %23 = arith.mulf %22, %21 : vector<1x16x16xf32>
    %24 = arith.addf %18, %23 : vector<1x16x16xf32>
    %c3 = arith.constant 3 : index
    %25 = memref.load %arg2[%c3] : memref<32xf32, #tpu.memory_space<smem>>
    %26 = vector.extract_strided_slice %4 {offsets = [0, 3, 0, 0], sizes = [1, 1, 16, 16], strides = [1, 1, 1, 1]} : vector<1x4x16x16xf32> to vector<1x1x16x16xf32>
    %27 = vector.shape_cast %26 : vector<1x1x16x16xf32> to vector<1x16x16xf32>
    %28 = vector.broadcast %25 : f32 to vector<1x16x16xf32>
    %29 = arith.mulf %28, %27 : vector<1x16x16xf32>
    %30 = arith.addf %24, %29 : vector<1x16x16xf32>
    %c0_13 = arith.constant 0 : index
    %c0_14 = arith.constant 0 : index
    %c1_15 = arith.constant 1 : index
    %c0_16 = arith.constant 0 : index
    %31 = vector.load %arg7[%c0_13, %c0_14, %c1_15, %c0_16] : memref<1x8x18x16xf32, #tpu.memory_space<vmem>>, vector<1x1x16x16xf32>
    %32 = vector.shape_cast %31 : vector<1x1x16x16xf32> to vector<1x16x16xf32>
    %33 = vector.shape_cast %30 : vector<1x16x16xf32> to vector<1x1x16x16xf32>
    tpu.vector_store %arg7[%c0_13, %c0_14, %c1_15, %c0_16], %33 {strides = array<i32>} : memref<1x8x18x16xf32, #tpu.memory_space<vmem>>, vector<1x1x16x16xf32>,
    %34 = vector.extract_strided_slice %4 {offsets = [0, 0, 0, 0], sizes = [1, 1, 16, 16], strides = [1, 1, 1, 1]} : vector<1x4x16x16xf32> to vector<1x1x16x16xf32>
    %35 = vector.shape_cast %34 : vector<1x1x16x16xf32> to vector<1x16x16xf32>
    %c4 = arith.constant 4 : index
    %36 = memref.load %arg2[%c4] : memref<32xf32, #tpu.memory_space<smem>>
    %37 = vector.broadcast %36 : f32 to vector<1x16x16xf32>
    %38 = arith.mulf %35, %37 : vector<1x16x16xf32>
    %c1_17 = arith.constant 1 : index
    %39 = memref.load %arg3[%c1_17] : memref<8xf32, #tpu.memory_space<smem>>
    %40 = vector.broadcast %39 : f32 to vector<1x16x16xf32>
    %41 = arith.addf %38, %40 : vector<1x16x16xf32>
    %c5 = arith.constant 5 : index
    %42 = memref.load %arg2[%c5] : memref<32xf32, #tpu.memory_space<smem>>
    %43 = vector.extract_strided_slice %4 {offsets = [0, 1, 0, 0], sizes = [1, 1, 16, 16], strides = [1, 1, 1, 1]} : vector<1x4x16x16xf32> to vector<1x1x16x16xf32>
    %44 = vector.shape_cast %43 : vector<1x1x16x16xf32> to vector<1x16x16xf32>
    %45 = vector.broadcast %42 : f32 to vector<1x16x16xf32>
    %46 = arith.mulf %45, %44 : vector<1x16x16xf32>
    %47 = arith.addf %41, %46 : vector<1x16x16xf32>
    %c6 = arith.constant 6 : index
    %48 = memref.load %arg2[%c6] : memref<32xf32, #tpu.memory_space<smem>>
    %49 = vector.extract_strided_slice %4 {offsets = [0, 2, 0, 0], sizes = [1, 1, 16, 16], strides = [1, 1, 1, 1]} : vector<1x4x16x16xf32> to vector<1x1x16x16xf32>
    %50 = vector.shape_cast %49 : vector<1x1x16x16xf32> to vector<1x16x16xf32>
    %51 = vector.broadcast %48 : f32 to vector<1x16x16xf32>
    %52 = arith.mulf %51, %50 : vector<1x16x16xf32>
    %53 = arith.addf %47, %52 : vector<1x16x16xf32>
    %c7 = arith.constant 7 : index
    %54 = memref.load %arg2[%c7] : memref<32xf32, #tpu.memory_space<smem>>
    %55 = vector.extract_strided_slice %4 {offsets = [0, 3, 0, 0], sizes = [1, 1, 16, 16], strides = [1, 1, 1, 1]} : vector<1x4x16x16xf32> to vector<1x1x16x16xf32>
    %56 = vector.shape_cast %55 : vector<1x1x16x16xf32> to vector<1x16x16xf32>
    %57 = vector.broadcast %54 : f32 to vector<1x16x16xf32>
    %58 = arith.mulf %57, %56 : vector<1x16x16xf32>
    %59 = arith.addf %53, %58 : vector<1x16x16xf32>
    %c0_18 = arith.constant 0 : index
    %c1_19 = arith.constant 1 : index
    %c1_20 = arith.constant 1 : index
    %c0_21 = arith.constant 0 : index
    %60 = vector.load %arg7[%c0_18, %c1_19, %c1_20, %c0_21] : memref<1x8x18x16xf32, #tpu.memory_space<vmem>>, vector<1x1x16x16xf32>
    %61 = vector.shape_cast %60 : vector<1x1x16x16xf32> to vector<1x16x16xf32>
    %62 = vector.shape_cast %59 : vector<1x16x16xf32> to vector<1x1x16x16xf32>
    tpu.vector_store %arg7[%c0_18, %c1_19, %c1_20, %c0_21], %62 {strides = array<i32>} : memref<1x8x18x16xf32, #tpu.memory_space<vmem>>, vector<1x1x16x16xf32>,
    %63 = vector.extract_strided_slice %4 {offsets = [0, 0, 0, 0], sizes = [1, 1, 16, 16], strides = [1, 1, 1, 1]} : vector<1x4x16x16xf32> to vector<1x1x16x16xf32>
    %64 = vector.shape_cast %63 : vector<1x1x16x16xf32> to vector<1x16x16xf32>
    %c8 = arith.constant 8 : index
    %65 = memref.load %arg2[%c8] : memref<32xf32, #tpu.memory_space<smem>>
    %66 = vector.broadcast %65 : f32 to vector<1x16x16xf32>
    %67 = arith.mulf %64, %66 : vector<1x16x16xf32>
    %c2_22 = arith.constant 2 : index
    %68 = memref.load %arg3[%c2_22] : memref<8xf32, #tpu.memory_space<smem>>
    %69 = vector.broadcast %68 : f32 to vector<1x16x16xf32>
    %70 = arith.addf %67, %69 : vector<1x16x16xf32>
    %c9 = arith.constant 9 : index
    %71 = memref.load %arg2[%c9] : memref<32xf32, #tpu.memory_space<smem>>
    %72 = vector.extract_strided_slice %4 {offsets = [0, 1, 0, 0], sizes = [1, 1, 16, 16], strides = [1, 1, 1, 1]} : vector<1x4x16x16xf32> to vector<1x1x16x16xf32>
    %73 = vector.shape_cast %72 : vector<1x1x16x16xf32> to vector<1x16x16xf32>
    %74 = vector.broadcast %71 : f32 to vector<1x16x16xf32>
    %75 = arith.mulf %74, %73 : vector<1x16x16xf32>
    %76 = arith.addf %70, %75 : vector<1x16x16xf32>
    %c10 = arith.constant 10 : index
    %77 = memref.load %arg2[%c10] : memref<32xf32, #tpu.memory_space<smem>>
    %78 = vector.extract_strided_slice %4 {offsets = [0, 2, 0, 0], sizes = [1, 1, 16, 16], strides = [1, 1, 1, 1]} : vector<1x4x16x16xf32> to vector<1x1x16x16xf32>
    %79 = vector.shape_cast %78 : vector<1x1x16x16xf32> to vector<1x16x16xf32>
    %80 = vector.broadcast %77 : f32 to vector<1x16x16xf32>
    %81 = arith.mulf %80, %79 : vector<1x16x16xf32>
    %82 = arith.addf %76, %81 : vector<1x16x16xf32>
    %c11 = arith.constant 11 : index
    %83 = memref.load %arg2[%c11] : memref<32xf32, #tpu.memory_space<smem>>
    %84 = vector.extract_strided_slice %4 {offsets = [0, 3, 0, 0], sizes = [1, 1, 16, 16], strides = [1, 1, 1, 1]} : vector<1x4x16x16xf32> to vector<1x1x16x16xf32>
    %85 = vector.shape_cast %84 : vector<1x1x16x16xf32> to vector<1x16x16xf32>
    %86 = vector.broadcast %83 : f32 to vector<1x16x16xf32>
    %87 = arith.mulf %86, %85 : vector<1x16x16xf32>
    %88 = arith.addf %82, %87 : vector<1x16x16xf32>
    %c0_23 = arith.constant 0 : index
    %c2_24 = arith.constant 2 : index
    %c1_25 = arith.constant 1 : index
    %c0_26 = arith.constant 0 : index
    %89 = vector.load %arg7[%c0_23, %c2_24, %c1_25, %c0_26] : memref<1x8x18x16xf32, #tpu.memory_space<vmem>>, vector<1x1x16x16xf32>
    %90 = vector.shape_cast %89 : vector<1x1x16x16xf32> to vector<1x16x16xf32>
    %91 = vector.shape_cast %88 : vector<1x16x16xf32> to vector<1x1x16x16xf32>
    tpu.vector_store %arg7[%c0_23, %c2_24, %c1_25, %c0_26], %91 {strides = array<i32>} : memref<1x8x18x16xf32, #tpu.memory_space<vmem>>, vector<1x1x16x16xf32>,
    %92 = vector.extract_strided_slice %4 {offsets = [0, 0, 0, 0], sizes = [1, 1, 16, 16], strides = [1, 1, 1, 1]} : vector<1x4x16x16xf32> to vector<1x1x16x16xf32>
    %93 = vector.shape_cast %92 : vector<1x1x16x16xf32> to vector<1x16x16xf32>
    %c12 = arith.constant 12 : index
    %94 = memref.load %arg2[%c12] : memref<32xf32, #tpu.memory_space<smem>>
    %95 = vector.broadcast %94 : f32 to vector<1x16x16xf32>
    %96 = arith.mulf %93, %95 : vector<1x16x16xf32>
    %c3_27 = arith.constant 3 : index
    %97 = memref.load %arg3[%c3_27] : memref<8xf32, #tpu.memory_space<smem>>
    %98 = vector.broadcast %97 : f32 to vector<1x16x16xf32>
    %99 = arith.addf %96, %98 : vector<1x16x16xf32>
    %c13 = arith.constant 13 : index
    %100 = memref.load %arg2[%c13] : memref<32xf32, #tpu.memory_space<smem>>
    %101 = vector.extract_strided_slice %4 {offsets = [0, 1, 0, 0], sizes = [1, 1, 16, 16], strides = [1, 1, 1, 1]} : vector<1x4x16x16xf32> to vector<1x1x16x16xf32>
    %102 = vector.shape_cast %101 : vector<1x1x16x16xf32> to vector<1x16x16xf32>
    %103 = vector.broadcast %100 : f32 to vector<1x16x16xf32>
    %104 = arith.mulf %103, %102 : vector<1x16x16xf32>
    %105 = arith.addf %99, %104 : vector<1x16x16xf32>
    %c14 = arith.constant 14 : index
    %106 = memref.load %arg2[%c14] : memref<32xf32, #tpu.memory_space<smem>>
    %107 = vector.extract_strided_slice %4 {offsets = [0, 2, 0, 0], sizes = [1, 1, 16, 16], strides = [1, 1, 1, 1]} : vector<1x4x16x16xf32> to vector<1x1x16x16xf32>
    %108 = vector.shape_cast %107 : vector<1x1x16x16xf32> to vector<1x16x16xf32>
    %109 = vector.broadcast %106 : f32 to vector<1x16x16xf32>
    %110 = arith.mulf %109, %108 : vector<1x16x16xf32>
    %111 = arith.addf %105, %110 : vector<1x16x16xf32>
    %c15 = arith.constant 15 : index
    %112 = memref.load %arg2[%c15] : memref<32xf32, #tpu.memory_space<smem>>
    %113 = vector.extract_strided_slice %4 {offsets = [0, 3, 0, 0], sizes = [1, 1, 16, 16], strides = [1, 1, 1, 1]} : vector<1x4x16x16xf32> to vector<1x1x16x16xf32>
    %114 = vector.shape_cast %113 : vector<1x1x16x16xf32> to vector<1x16x16xf32>
    %115 = vector.broadcast %112 : f32 to vector<1x16x16xf32>
    %116 = arith.mulf %115, %114 : vector<1x16x16xf32>
    %117 = arith.addf %111, %116 : vector<1x16x16xf32>
    %c0_28 = arith.constant 0 : index
    %c3_29 = arith.constant 3 : index
    %c1_30 = arith.constant 1 : index
    %c0_31 = arith.constant 0 : index
    %118 = vector.load %arg7[%c0_28, %c3_29, %c1_30, %c0_31] : memref<1x8x18x16xf32, #tpu.memory_space<vmem>>, vector<1x1x16x16xf32>
    %119 = vector.shape_cast %118 : vector<1x1x16x16xf32> to vector<1x16x16xf32>
    %120 = vector.shape_cast %117 : vector<1x16x16xf32> to vector<1x1x16x16xf32>
    tpu.vector_store %arg7[%c0_28, %c3_29, %c1_30, %c0_31], %120 {strides = array<i32>} : memref<1x8x18x16xf32, #tpu.memory_space<vmem>>, vector<1x1x16x16xf32>,
    %121 = vector.extract_strided_slice %4 {offsets = [0, 0, 0, 0], sizes = [1, 1, 16, 16], strides = [1, 1, 1, 1]} : vector<1x4x16x16xf32> to vector<1x1x16x16xf32>
    %122 = vector.shape_cast %121 : vector<1x1x16x16xf32> to vector<1x16x16xf32>
    %c16 = arith.constant 16 : index
    %123 = memref.load %arg2[%c16] : memref<32xf32, #tpu.memory_space<smem>>
    %124 = vector.broadcast %123 : f32 to vector<1x16x16xf32>
    %125 = arith.mulf %122, %124 : vector<1x16x16xf32>
    %c4_32 = arith.constant 4 : index
    %126 = memref.load %arg3[%c4_32] : memref<8xf32, #tpu.memory_space<smem>>
    %127 = vector.broadcast %126 : f32 to vector<1x16x16xf32>
    %128 = arith.addf %125, %127 : vector<1x16x16xf32>
    %c17_33 = arith.constant 17 : index
    %129 = memref.load %arg2[%c17_33] : memref<32xf32, #tpu.memory_space<smem>>
    %130 = vector.extract_strided_slice %4 {offsets = [0, 1, 0, 0], sizes = [1, 1, 16, 16], strides = [1, 1, 1, 1]} : vector<1x4x16x16xf32> to vector<1x1x16x16xf32>
    %131 = vector.shape_cast %130 : vector<1x1x16x16xf32> to vector<1x16x16xf32>
    %132 = vector.broadcast %129 : f32 to vector<1x16x16xf32>
    %133 = arith.mulf %132, %131 : vector<1x16x16xf32>
    %134 = arith.addf %128, %133 : vector<1x16x16xf32>
    %c18 = arith.constant 18 : index
    %135 = memref.load %arg2[%c18] : memref<32xf32, #tpu.memory_space<smem>>
    %136 = vector.extract_strided_slice %4 {offsets = [0, 2, 0, 0], sizes = [1, 1, 16, 16], strides = [1, 1, 1, 1]} : vector<1x4x16x16xf32> to vector<1x1x16x16xf32>
    %137 = vector.shape_cast %136 : vector<1x1x16x16xf32> to vector<1x16x16xf32>
    %138 = vector.broadcast %135 : f32 to vector<1x16x16xf32>
    %139 = arith.mulf %138, %137 : vector<1x16x16xf32>
    %140 = arith.addf %134, %139 : vector<1x16x16xf32>
    %c19 = arith.constant 19 : index
    %141 = memref.load %arg2[%c19] : memref<32xf32, #tpu.memory_space<smem>>
    %142 = vector.extract_strided_slice %4 {offsets = [0, 3, 0, 0], sizes = [1, 1, 16, 16], strides = [1, 1, 1, 1]} : vector<1x4x16x16xf32> to vector<1x1x16x16xf32>
    %143 = vector.shape_cast %142 : vector<1x1x16x16xf32> to vector<1x16x16xf32>
    %144 = vector.broadcast %141 : f32 to vector<1x16x16xf32>
    %145 = arith.mulf %144, %143 : vector<1x16x16xf32>
    %146 = arith.addf %140, %145 : vector<1x16x16xf32>
    %c0_34 = arith.constant 0 : index
    %c4_35 = arith.constant 4 : index
    %c1_36 = arith.constant 1 : index
    %c0_37 = arith.constant 0 : index
    %147 = vector.load %arg7[%c0_34, %c4_35, %c1_36, %c0_37] : memref<1x8x18x16xf32, #tpu.memory_space<vmem>>, vector<1x1x16x16xf32>
    %148 = vector.shape_cast %147 : vector<1x1x16x16xf32> to vector<1x16x16xf32>
    %149 = vector.shape_cast %146 : vector<1x16x16xf32> to vector<1x1x16x16xf32>
    tpu.vector_store %arg7[%c0_34, %c4_35, %c1_36, %c0_37], %149 {strides = array<i32>} : memref<1x8x18x16xf32, #tpu.memory_space<vmem>>, vector<1x1x16x16xf32>,
    %150 = vector.extract_strided_slice %4 {offsets = [0, 0, 0, 0], sizes = [1, 1, 16, 16], strides = [1, 1, 1, 1]} : vector<1x4x16x16xf32> to vector<1x1x16x16xf32>
    %151 = vector.shape_cast %150 : vector<1x1x16x16xf32> to vector<1x16x16xf32>
    %c20 = arith.constant 20 : index
    %152 = memref.load %arg2[%c20] : memref<32xf32, #tpu.memory_space<smem>>
    %153 = vector.broadcast %152 : f32 to vector<1x16x16xf32>
    %154 = arith.mulf %151, %153 : vector<1x16x16xf32>
    %c5_38 = arith.constant 5 : index
    %155 = memref.load %arg3[%c5_38] : memref<8xf32, #tpu.memory_space<smem>>
    %156 = vector.broadcast %155 : f32 to vector<1x16x16xf32>
    %157 = arith.addf %154, %156 : vector<1x16x16xf32>
    %c21 = arith.constant 21 : index
    %158 = memref.load %arg2[%c21] : memref<32xf32, #tpu.memory_space<smem>>
    %159 = vector.extract_strided_slice %4 {offsets = [0, 1, 0, 0], sizes = [1, 1, 16, 16], strides = [1, 1, 1, 1]} : vector<1x4x16x16xf32> to vector<1x1x16x16xf32>
    %160 = vector.shape_cast %159 : vector<1x1x16x16xf32> to vector<1x16x16xf32>
    %161 = vector.broadcast %158 : f32 to vector<1x16x16xf32>
    %162 = arith.mulf %161, %160 : vector<1x16x16xf32>
    %163 = arith.addf %157, %162 : vector<1x16x16xf32>
    %c22 = arith.constant 22 : index
    %164 = memref.load %arg2[%c22] : memref<32xf32, #tpu.memory_space<smem>>
    %165 = vector.extract_strided_slice %4 {offsets = [0, 2, 0, 0], sizes = [1, 1, 16, 16], strides = [1, 1, 1, 1]} : vector<1x4x16x16xf32> to vector<1x1x16x16xf32>
    %166 = vector.shape_cast %165 : vector<1x1x16x16xf32> to vector<1x16x16xf32>
    %167 = vector.broadcast %164 : f32 to vector<1x16x16xf32>
    %168 = arith.mulf %167, %166 : vector<1x16x16xf32>
    %169 = arith.addf %163, %168 : vector<1x16x16xf32>
    %c23 = arith.constant 23 : index
    %170 = memref.load %arg2[%c23] : memref<32xf32, #tpu.memory_space<smem>>
    %171 = vector.extract_strided_slice %4 {offsets = [0, 3, 0, 0], sizes = [1, 1, 16, 16], strides = [1, 1, 1, 1]} : vector<1x4x16x16xf32> to vector<1x1x16x16xf32>
    %172 = vector.shape_cast %171 : vector<1x1x16x16xf32> to vector<1x16x16xf32>
    %173 = vector.broadcast %170 : f32 to vector<1x16x16xf32>
    %174 = arith.mulf %173, %172 : vector<1x16x16xf32>
    %175 = arith.addf %169, %174 : vector<1x16x16xf32>
    %c0_39 = arith.constant 0 : index
    %c5_40 = arith.constant 5 : index
    %c1_41 = arith.constant 1 : index
    %c0_42 = arith.constant 0 : index
    %176 = vector.load %arg7[%c0_39, %c5_40, %c1_41, %c0_42] : memref<1x8x18x16xf32, #tpu.memory_space<vmem>>, vector<1x1x16x16xf32>
    %177 = vector.shape_cast %176 : vector<1x1x16x16xf32> to vector<1x16x16xf32>
    %178 = vector.shape_cast %175 : vector<1x16x16xf32> to vector<1x1x16x16xf32>
    tpu.vector_store %arg7[%c0_39, %c5_40, %c1_41, %c0_42], %178 {strides = array<i32>} : memref<1x8x18x16xf32, #tpu.memory_space<vmem>>, vector<1x1x16x16xf32>,
    %179 = vector.extract_strided_slice %4 {offsets = [0, 0, 0, 0], sizes = [1, 1, 16, 16], strides = [1, 1, 1, 1]} : vector<1x4x16x16xf32> to vector<1x1x16x16xf32>
    %180 = vector.shape_cast %179 : vector<1x1x16x16xf32> to vector<1x16x16xf32>
    %c24 = arith.constant 24 : index
    %181 = memref.load %arg2[%c24] : memref<32xf32, #tpu.memory_space<smem>>
    %182 = vector.broadcast %181 : f32 to vector<1x16x16xf32>
    %183 = arith.mulf %180, %182 : vector<1x16x16xf32>
    %c6_43 = arith.constant 6 : index
    %184 = memref.load %arg3[%c6_43] : memref<8xf32, #tpu.memory_space<smem>>
    %185 = vector.broadcast %184 : f32 to vector<1x16x16xf32>
    %186 = arith.addf %183, %185 : vector<1x16x16xf32>
    %c25 = arith.constant 25 : index
    %187 = memref.load %arg2[%c25] : memref<32xf32, #tpu.memory_space<smem>>
    %188 = vector.extract_strided_slice %4 {offsets = [0, 1, 0, 0], sizes = [1, 1, 16, 16], strides = [1, 1, 1, 1]} : vector<1x4x16x16xf32> to vector<1x1x16x16xf32>
    %189 = vector.shape_cast %188 : vector<1x1x16x16xf32> to vector<1x16x16xf32>
    %190 = vector.broadcast %187 : f32 to vector<1x16x16xf32>
    %191 = arith.mulf %190, %189 : vector<1x16x16xf32>
    %192 = arith.addf %186, %191 : vector<1x16x16xf32>
    %c26 = arith.constant 26 : index
    %193 = memref.load %arg2[%c26] : memref<32xf32, #tpu.memory_space<smem>>
    %194 = vector.extract_strided_slice %4 {offsets = [0, 2, 0, 0], sizes = [1, 1, 16, 16], strides = [1, 1, 1, 1]} : vector<1x4x16x16xf32> to vector<1x1x16x16xf32>
    %195 = vector.shape_cast %194 : vector<1x1x16x16xf32> to vector<1x16x16xf32>
    %196 = vector.broadcast %193 : f32 to vector<1x16x16xf32>
    %197 = arith.mulf %196, %195 : vector<1x16x16xf32>
    %198 = arith.addf %192, %197 : vector<1x16x16xf32>
    %c27 = arith.constant 27 : index
    %199 = memref.load %arg2[%c27] : memref<32xf32, #tpu.memory_space<smem>>
    %200 = vector.extract_strided_slice %4 {offsets = [0, 3, 0, 0], sizes = [1, 1, 16, 16], strides = [1, 1, 1, 1]} : vector<1x4x16x16xf32> to vector<1x1x16x16xf32>
    %201 = vector.shape_cast %200 : vector<1x1x16x16xf32> to vector<1x16x16xf32>
    %202 = vector.broadcast %199 : f32 to vector<1x16x16xf32>
    %203 = arith.mulf %202, %201 : vector<1x16x16xf32>
    %204 = arith.addf %198, %203 : vector<1x16x16xf32>
    %c0_44 = arith.constant 0 : index
    %c6_45 = arith.constant 6 : index
    %c1_46 = arith.constant 1 : index
    %c0_47 = arith.constant 0 : index
    %205 = vector.load %arg7[%c0_44, %c6_45, %c1_46, %c0_47] : memref<1x8x18x16xf32, #tpu.memory_space<vmem>>, vector<1x1x16x16xf32>
    %206 = vector.shape_cast %205 : vector<1x1x16x16xf32> to vector<1x16x16xf32>
    %207 = vector.shape_cast %204 : vector<1x16x16xf32> to vector<1x1x16x16xf32>
    tpu.vector_store %arg7[%c0_44, %c6_45, %c1_46, %c0_47], %207 {strides = array<i32>} : memref<1x8x18x16xf32, #tpu.memory_space<vmem>>, vector<1x1x16x16xf32>,
    %208 = vector.extract_strided_slice %4 {offsets = [0, 0, 0, 0], sizes = [1, 1, 16, 16], strides = [1, 1, 1, 1]} : vector<1x4x16x16xf32> to vector<1x1x16x16xf32>
    %209 = vector.shape_cast %208 : vector<1x1x16x16xf32> to vector<1x16x16xf32>
    %c28 = arith.constant 28 : index
    %210 = memref.load %arg2[%c28] : memref<32xf32, #tpu.memory_space<smem>>
    %211 = vector.broadcast %210 : f32 to vector<1x16x16xf32>
    %212 = arith.mulf %209, %211 : vector<1x16x16xf32>
    %c7_48 = arith.constant 7 : index
    %213 = memref.load %arg3[%c7_48] : memref<8xf32, #tpu.memory_space<smem>>
    %214 = vector.broadcast %213 : f32 to vector<1x16x16xf32>
    %215 = arith.addf %212, %214 : vector<1x16x16xf32>
    %c29 = arith.constant 29 : index
    %216 = memref.load %arg2[%c29] : memref<32xf32, #tpu.memory_space<smem>>
    %217 = vector.extract_strided_slice %4 {offsets = [0, 1, 0, 0], sizes = [1, 1, 16, 16], strides = [1, 1, 1, 1]} : vector<1x4x16x16xf32> to vector<1x1x16x16xf32>
    %218 = vector.shape_cast %217 : vector<1x1x16x16xf32> to vector<1x16x16xf32>
    %219 = vector.broadcast %216 : f32 to vector<1x16x16xf32>
    %220 = arith.mulf %219, %218 : vector<1x16x16xf32>
    %221 = arith.addf %215, %220 : vector<1x16x16xf32>
    %c30 = arith.constant 30 : index
    %222 = memref.load %arg2[%c30] : memref<32xf32, #tpu.memory_space<smem>>
    %223 = vector.extract_strided_slice %4 {offsets = [0, 2, 0, 0], sizes = [1, 1, 16, 16], strides = [1, 1, 1, 1]} : vector<1x4x16x16xf32> to vector<1x1x16x16xf32>
    %224 = vector.shape_cast %223 : vector<1x1x16x16xf32> to vector<1x16x16xf32>
    %225 = vector.broadcast %222 : f32 to vector<1x16x16xf32>
    %226 = arith.mulf %225, %224 : vector<1x16x16xf32>
    %227 = arith.addf %221, %226 : vector<1x16x16xf32>
    %c31 = arith.constant 31 : index
    %228 = memref.load %arg2[%c31] : memref<32xf32, #tpu.memory_space<smem>>
    %229 = vector.extract_strided_slice %4 {offsets = [0, 3, 0, 0], sizes = [1, 1, 16, 16], strides = [1, 1, 1, 1]} : vector<1x4x16x16xf32> to vector<1x1x16x16xf32>
    %230 = vector.shape_cast %229 : vector<1x1x16x16xf32> to vector<1x16x16xf32>
    %231 = vector.broadcast %228 : f32 to vector<1x16x16xf32>
    %232 = arith.mulf %231, %230 : vector<1x16x16xf32>
    %233 = arith.addf %227, %232 : vector<1x16x16xf32>
    %c0_49 = arith.constant 0 : index
    %c7_50 = arith.constant 7 : index
    %c1_51 = arith.constant 1 : index
    %c0_52 = arith.constant 0 : index
    %234 = vector.load %arg7[%c0_49, %c7_50, %c1_51, %c0_52] : memref<1x8x18x16xf32, #tpu.memory_space<vmem>>, vector<1x1x16x16xf32>
    %235 = vector.shape_cast %234 : vector<1x1x16x16xf32> to vector<1x16x16xf32>
    %236 = vector.shape_cast %233 : vector<1x16x16xf32> to vector<1x1x16x16xf32>
    tpu.vector_store %arg7[%c0_49, %c7_50, %c1_51, %c0_52], %236 {strides = array<i32>} : memref<1x8x18x16xf32, #tpu.memory_space<vmem>>, vector<1x1x16x16xf32>,
    %cst_53 = arith.constant 0.000000e+00 : f32
    %237 = vector.broadcast %cst_53 : f32 to vector<1x16x16xf32>
    %cst_54 = arith.constant 0.000000e+00 : f32
    %238 = vector.broadcast %cst_54 : f32 to vector<1x16x16xf32>
    %cst_55 = arith.constant 0.000000e+00 : f32
    %239 = vector.broadcast %cst_55 : f32 to vector<1x16x16xf32>
    %c0_56 = arith.constant 0 : index
    %c0_57 = arith.constant 0 : index
    %c0_58 = arith.constant 0 : index
    %c0_59 = arith.constant 0 : index
    %240 = vector.load %arg7[%c0_56, %c0_57, %c0_58, %c0_59] : memref<1x8x18x16xf32, #tpu.memory_space<vmem>>, vector<1x1x16x16xf32>
    %241 = vector.shape_cast %240 : vector<1x1x16x16xf32> to vector<1x16x16xf32>
    %c0_60 = arith.constant 0 : index
    %242 = memref.load %arg4[%c0_60] : memref<72xf32, #tpu.memory_space<smem>>
    %243 = vector.broadcast %242 : f32 to vector<1x16x16xf32>
    %244 = arith.mulf %243, %241 : vector<1x16x16xf32>
    %245 = arith.addf %237, %244 : vector<1x16x16xf32>
    %c1_61 = arith.constant 1 : index
    %246 = memref.load %arg4[%c1_61] : memref<72xf32, #tpu.memory_space<smem>>
    %247 = vector.broadcast %246 : f32 to vector<1x16x16xf32>
    %248 = arith.mulf %247, %241 : vector<1x16x16xf32>
    %249 = arith.addf %238, %248 : vector<1x16x16xf32>
    %c2_62 = arith.constant 2 : index
    %250 = memref.load %arg4[%c2_62] : memref<72xf32, #tpu.memory_space<smem>>
    %251 = vector.broadcast %250 : f32 to vector<1x16x16xf32>
    %252 = arith.mulf %251, %241 : vector<1x16x16xf32>
    %253 = arith.addf %239, %252 : vector<1x16x16xf32>
    %c0_63 = arith.constant 0 : index
    %c0_64 = arith.constant 0 : index
    %c1_65 = arith.constant 1 : index
    %c0_66 = arith.constant 0 : index
    %254 = vector.load %arg7[%c0_63, %c0_64, %c1_65, %c0_66] : memref<1x8x18x16xf32, #tpu.memory_space<vmem>>, vector<1x1x16x16xf32>
    %255 = vector.shape_cast %254 : vector<1x1x16x16xf32> to vector<1x16x16xf32>
    %c3_67 = arith.constant 3 : index
    %256 = memref.load %arg4[%c3_67] : memref<72xf32, #tpu.memory_space<smem>>
    %257 = vector.broadcast %256 : f32 to vector<1x16x16xf32>
    %258 = arith.mulf %257, %255 : vector<1x16x16xf32>
    %259 = arith.addf %245, %258 : vector<1x16x16xf32>
    %c4_68 = arith.constant 4 : index
    %260 = memref.load %arg4[%c4_68] : memref<72xf32, #tpu.memory_space<smem>>
    %261 = vector.broadcast %260 : f32 to vector<1x16x16xf32>
    %262 = arith.mulf %261, %255 : vector<1x16x16xf32>
    %263 = arith.addf %249, %262 : vector<1x16x16xf32>
    %c5_69 = arith.constant 5 : index
    %264 = memref.load %arg4[%c5_69] : memref<72xf32, #tpu.memory_space<smem>>
    %265 = vector.broadcast %264 : f32 to vector<1x16x16xf32>
    %266 = arith.mulf %265, %255 : vector<1x16x16xf32>
    %267 = arith.addf %253, %266 : vector<1x16x16xf32>
    %c0_70 = arith.constant 0 : index
    %c0_71 = arith.constant 0 : index
    %c2_72 = arith.constant 2 : index
    %c0_73 = arith.constant 0 : index
    %268 = vector.load %arg7[%c0_70, %c0_71, %c2_72, %c0_73] : memref<1x8x18x16xf32, #tpu.memory_space<vmem>>, vector<1x1x16x16xf32>
    %269 = vector.shape_cast %268 : vector<1x1x16x16xf32> to vector<1x16x16xf32>
    %c6_74 = arith.constant 6 : index
    %270 = memref.load %arg4[%c6_74] : memref<72xf32, #tpu.memory_space<smem>>
    %271 = vector.broadcast %270 : f32 to vector<1x16x16xf32>
    %272 = arith.mulf %271, %269 : vector<1x16x16xf32>
    %273 = arith.addf %259, %272 : vector<1x16x16xf32>
    %c7_75 = arith.constant 7 : index
    %274 = memref.load %arg4[%c7_75] : memref<72xf32, #tpu.memory_space<smem>>
    %275 = vector.broadcast %274 : f32 to vector<1x16x16xf32>
    %276 = arith.mulf %275, %269 : vector<1x16x16xf32>
    %277 = arith.addf %263, %276 : vector<1x16x16xf32>
    %c8_76 = arith.constant 8 : index
    %278 = memref.load %arg4[%c8_76] : memref<72xf32, #tpu.memory_space<smem>>
    %279 = vector.broadcast %278 : f32 to vector<1x16x16xf32>
    %280 = arith.mulf %279, %269 : vector<1x16x16xf32>
    %281 = arith.addf %267, %280 : vector<1x16x16xf32>
    %c0_77 = arith.constant 0 : index
    %c1_78 = arith.constant 1 : index
    %c0_79 = arith.constant 0 : index
    %c0_80 = arith.constant 0 : index
    %282 = vector.load %arg7[%c0_77, %c1_78, %c0_79, %c0_80] : memref<1x8x18x16xf32, #tpu.memory_space<vmem>>, vector<1x1x16x16xf32>
    %283 = vector.shape_cast %282 : vector<1x1x16x16xf32> to vector<1x16x16xf32>
    %c9_81 = arith.constant 9 : index
    %284 = memref.load %arg4[%c9_81] : memref<72xf32, #tpu.memory_space<smem>>
    %285 = vector.broadcast %284 : f32 to vector<1x16x16xf32>
    %286 = arith.mulf %285, %283 : vector<1x16x16xf32>
    %287 = arith.addf %273, %286 : vector<1x16x16xf32>
    %c10_82 = arith.constant 10 : index
    %288 = memref.load %arg4[%c10_82] : memref<72xf32, #tpu.memory_space<smem>>
    %289 = vector.broadcast %288 : f32 to vector<1x16x16xf32>
    %290 = arith.mulf %289, %283 : vector<1x16x16xf32>
    %291 = arith.addf %277, %290 : vector<1x16x16xf32>
    %c11_83 = arith.constant 11 : index
    %292 = memref.load %arg4[%c11_83] : memref<72xf32, #tpu.memory_space<smem>>
    %293 = vector.broadcast %292 : f32 to vector<1x16x16xf32>
    %294 = arith.mulf %293, %283 : vector<1x16x16xf32>
    %295 = arith.addf %281, %294 : vector<1x16x16xf32>
    %c0_84 = arith.constant 0 : index
    %c1_85 = arith.constant 1 : index
    %c1_86 = arith.constant 1 : index
    %c0_87 = arith.constant 0 : index
    %296 = vector.load %arg7[%c0_84, %c1_85, %c1_86, %c0_87] : memref<1x8x18x16xf32, #tpu.memory_space<vmem>>, vector<1x1x16x16xf32>
    %297 = vector.shape_cast %296 : vector<1x1x16x16xf32> to vector<1x16x16xf32>
    %c12_88 = arith.constant 12 : index
    %298 = memref.load %arg4[%c12_88] : memref<72xf32, #tpu.memory_space<smem>>
    %299 = vector.broadcast %298 : f32 to vector<1x16x16xf32>
    %300 = arith.mulf %299, %297 : vector<1x16x16xf32>
    %301 = arith.addf %287, %300 : vector<1x16x16xf32>
    %c13_89 = arith.constant 13 : index
    %302 = memref.load %arg4[%c13_89] : memref<72xf32, #tpu.memory_space<smem>>
    %303 = vector.broadcast %302 : f32 to vector<1x16x16xf32>
    %304 = arith.mulf %303, %297 : vector<1x16x16xf32>
    %305 = arith.addf %291, %304 : vector<1x16x16xf32>
    %c14_90 = arith.constant 14 : index
    %306 = memref.load %arg4[%c14_90] : memref<72xf32, #tpu.memory_space<smem>>
    %307 = vector.broadcast %306 : f32 to vector<1x16x16xf32>
    %308 = arith.mulf %307, %297 : vector<1x16x16xf32>
    %309 = arith.addf %295, %308 : vector<1x16x16xf32>
    %c0_91 = arith.constant 0 : index
    %c1_92 = arith.constant 1 : index
    %c2_93 = arith.constant 2 : index
    %c0_94 = arith.constant 0 : index
    %310 = vector.load %arg7[%c0_91, %c1_92, %c2_93, %c0_94] : memref<1x8x18x16xf32, #tpu.memory_space<vmem>>, vector<1x1x16x16xf32>
    %311 = vector.shape_cast %310 : vector<1x1x16x16xf32> to vector<1x16x16xf32>
    %c15_95 = arith.constant 15 : index
    %312 = memref.load %arg4[%c15_95] : memref<72xf32, #tpu.memory_space<smem>>
    %313 = vector.broadcast %312 : f32 to vector<1x16x16xf32>
    %314 = arith.mulf %313, %311 : vector<1x16x16xf32>
    %315 = arith.addf %301, %314 : vector<1x16x16xf32>
    %c16_96 = arith.constant 16 : index
    %316 = memref.load %arg4[%c16_96] : memref<72xf32, #tpu.memory_space<smem>>
    %317 = vector.broadcast %316 : f32 to vector<1x16x16xf32>
    %318 = arith.mulf %317, %311 : vector<1x16x16xf32>
    %319 = arith.addf %305, %318 : vector<1x16x16xf32>
    %c17_97 = arith.constant 17 : index
    %320 = memref.load %arg4[%c17_97] : memref<72xf32, #tpu.memory_space<smem>>
    %321 = vector.broadcast %320 : f32 to vector<1x16x16xf32>
    %322 = arith.mulf %321, %311 : vector<1x16x16xf32>
    %323 = arith.addf %309, %322 : vector<1x16x16xf32>
    %c0_98 = arith.constant 0 : index
    %c2_99 = arith.constant 2 : index
    %c0_100 = arith.constant 0 : index
    %c0_101 = arith.constant 0 : index
    %324 = vector.load %arg7[%c0_98, %c2_99, %c0_100, %c0_101] : memref<1x8x18x16xf32, #tpu.memory_space<vmem>>, vector<1x1x16x16xf32>
    %325 = vector.shape_cast %324 : vector<1x1x16x16xf32> to vector<1x16x16xf32>
    %c18_102 = arith.constant 18 : index
    %326 = memref.load %arg4[%c18_102] : memref<72xf32, #tpu.memory_space<smem>>
    %327 = vector.broadcast %326 : f32 to vector<1x16x16xf32>
    %328 = arith.mulf %327, %325 : vector<1x16x16xf32>
    %329 = arith.addf %315, %328 : vector<1x16x16xf32>
    %c19_103 = arith.constant 19 : index
    %330 = memref.load %arg4[%c19_103] : memref<72xf32, #tpu.memory_space<smem>>
    %331 = vector.broadcast %330 : f32 to vector<1x16x16xf32>
    %332 = arith.mulf %331, %325 : vector<1x16x16xf32>
    %333 = arith.addf %319, %332 : vector<1x16x16xf32>
    %c20_104 = arith.constant 20 : index
    %334 = memref.load %arg4[%c20_104] : memref<72xf32, #tpu.memory_space<smem>>
    %335 = vector.broadcast %334 : f32 to vector<1x16x16xf32>
    %336 = arith.mulf %335, %325 : vector<1x16x16xf32>
    %337 = arith.addf %323, %336 : vector<1x16x16xf32>
    %c0_105 = arith.constant 0 : index
    %c2_106 = arith.constant 2 : index
    %c1_107 = arith.constant 1 : index
    %c0_108 = arith.constant 0 : index
    %338 = vector.load %arg7[%c0_105, %c2_106, %c1_107, %c0_108] : memref<1x8x18x16xf32, #tpu.memory_space<vmem>>, vector<1x1x16x16xf32>
    %339 = vector.shape_cast %338 : vector<1x1x16x16xf32> to vector<1x16x16xf32>
    %c21_109 = arith.constant 21 : index
    %340 = memref.load %arg4[%c21_109] : memref<72xf32, #tpu.memory_space<smem>>
    %341 = vector.broadcast %340 : f32 to vector<1x16x16xf32>
    %342 = arith.mulf %341, %339 : vector<1x16x16xf32>
    %343 = arith.addf %329, %342 : vector<1x16x16xf32>
    %c22_110 = arith.constant 22 : index
    %344 = memref.load %arg4[%c22_110] : memref<72xf32, #tpu.memory_space<smem>>
    %345 = vector.broadcast %344 : f32 to vector<1x16x16xf32>
    %346 = arith.mulf %345, %339 : vector<1x16x16xf32>
    %347 = arith.addf %333, %346 : vector<1x16x16xf32>
    %c23_111 = arith.constant 23 : index
    %348 = memref.load %arg4[%c23_111] : memref<72xf32, #tpu.memory_space<smem>>
    %349 = vector.broadcast %348 : f32 to vector<1x16x16xf32>
    %350 = arith.mulf %349, %339 : vector<1x16x16xf32>
    %351 = arith.addf %337, %350 : vector<1x16x16xf32>
    %c0_112 = arith.constant 0 : index
    %c2_113 = arith.constant 2 : index
    %c2_114 = arith.constant 2 : index
    %c0_115 = arith.constant 0 : index
    %352 = vector.load %arg7[%c0_112, %c2_113, %c2_114, %c0_115] : memref<1x8x18x16xf32, #tpu.memory_space<vmem>>, vector<1x1x16x16xf32>
    %353 = vector.shape_cast %352 : vector<1x1x16x16xf32> to vector<1x16x16xf32>
    %c24_116 = arith.constant 24 : index
    %354 = memref.load %arg4[%c24_116] : memref<72xf32, #tpu.memory_space<smem>>
    %355 = vector.broadcast %354 : f32 to vector<1x16x16xf32>
    %356 = arith.mulf %355, %353 : vector<1x16x16xf32>
    %357 = arith.addf %343, %356 : vector<1x16x16xf32>
    %c25_117 = arith.constant 25 : index
    %358 = memref.load %arg4[%c25_117] : memref<72xf32, #tpu.memory_space<smem>>
    %359 = vector.broadcast %358 : f32 to vector<1x16x16xf32>
    %360 = arith.mulf %359, %353 : vector<1x16x16xf32>
    %361 = arith.addf %347, %360 : vector<1x16x16xf32>
    %c26_118 = arith.constant 26 : index
    %362 = memref.load %arg4[%c26_118] : memref<72xf32, #tpu.memory_space<smem>>
    %363 = vector.broadcast %362 : f32 to vector<1x16x16xf32>
    %364 = arith.mulf %363, %353 : vector<1x16x16xf32>
    %365 = arith.addf %351, %364 : vector<1x16x16xf32>
    %c0_119 = arith.constant 0 : index
    %c3_120 = arith.constant 3 : index
    %c0_121 = arith.constant 0 : index
    %c0_122 = arith.constant 0 : index
    %366 = vector.load %arg7[%c0_119, %c3_120, %c0_121, %c0_122] : memref<1x8x18x16xf32, #tpu.memory_space<vmem>>, vector<1x1x16x16xf32>
    %367 = vector.shape_cast %366 : vector<1x1x16x16xf32> to vector<1x16x16xf32>
    %c27_123 = arith.constant 27 : index
    %368 = memref.load %arg4[%c27_123] : memref<72xf32, #tpu.memory_space<smem>>
    %369 = vector.broadcast %368 : f32 to vector<1x16x16xf32>
    %370 = arith.mulf %369, %367 : vector<1x16x16xf32>
    %371 = arith.addf %357, %370 : vector<1x16x16xf32>
    %c28_124 = arith.constant 28 : index
    %372 = memref.load %arg4[%c28_124] : memref<72xf32, #tpu.memory_space<smem>>
    %373 = vector.broadcast %372 : f32 to vector<1x16x16xf32>
    %374 = arith.mulf %373, %367 : vector<1x16x16xf32>
    %375 = arith.addf %361, %374 : vector<1x16x16xf32>
    %c29_125 = arith.constant 29 : index
    %376 = memref.load %arg4[%c29_125] : memref<72xf32, #tpu.memory_space<smem>>
    %377 = vector.broadcast %376 : f32 to vector<1x16x16xf32>
    %378 = arith.mulf %377, %367 : vector<1x16x16xf32>
    %379 = arith.addf %365, %378 : vector<1x16x16xf32>
    %c0_126 = arith.constant 0 : index
    %c3_127 = arith.constant 3 : index
    %c1_128 = arith.constant 1 : index
    %c0_129 = arith.constant 0 : index
    %380 = vector.load %arg7[%c0_126, %c3_127, %c1_128, %c0_129] : memref<1x8x18x16xf32, #tpu.memory_space<vmem>>, vector<1x1x16x16xf32>
    %381 = vector.shape_cast %380 : vector<1x1x16x16xf32> to vector<1x16x16xf32>
    %c30_130 = arith.constant 30 : index
    %382 = memref.load %arg4[%c30_130] : memref<72xf32, #tpu.memory_space<smem>>
    %383 = vector.broadcast %382 : f32 to vector<1x16x16xf32>
    %384 = arith.mulf %383, %381 : vector<1x16x16xf32>
    %385 = arith.addf %371, %384 : vector<1x16x16xf32>
    %c31_131 = arith.constant 31 : index
    %386 = memref.load %arg4[%c31_131] : memref<72xf32, #tpu.memory_space<smem>>
    %387 = vector.broadcast %386 : f32 to vector<1x16x16xf32>
    %388 = arith.mulf %387, %381 : vector<1x16x16xf32>
    %389 = arith.addf %375, %388 : vector<1x16x16xf32>
    %c32 = arith.constant 32 : index
    %390 = memref.load %arg4[%c32] : memref<72xf32, #tpu.memory_space<smem>>
    %391 = vector.broadcast %390 : f32 to vector<1x16x16xf32>
    %392 = arith.mulf %391, %381 : vector<1x16x16xf32>
    %393 = arith.addf %379, %392 : vector<1x16x16xf32>
    %c0_132 = arith.constant 0 : index
    %c3_133 = arith.constant 3 : index
    %c2_134 = arith.constant 2 : index
    %c0_135 = arith.constant 0 : index
    %394 = vector.load %arg7[%c0_132, %c3_133, %c2_134, %c0_135] : memref<1x8x18x16xf32, #tpu.memory_space<vmem>>, vector<1x1x16x16xf32>
    %395 = vector.shape_cast %394 : vector<1x1x16x16xf32> to vector<1x16x16xf32>
    %c33 = arith.constant 33 : index
    %396 = memref.load %arg4[%c33] : memref<72xf32, #tpu.memory_space<smem>>
    %397 = vector.broadcast %396 : f32 to vector<1x16x16xf32>
    %398 = arith.mulf %397, %395 : vector<1x16x16xf32>
    %399 = arith.addf %385, %398 : vector<1x16x16xf32>
    %c34 = arith.constant 34 : index
    %400 = memref.load %arg4[%c34] : memref<72xf32, #tpu.memory_space<smem>>
    %401 = vector.broadcast %400 : f32 to vector<1x16x16xf32>
    %402 = arith.mulf %401, %395 : vector<1x16x16xf32>
    %403 = arith.addf %389, %402 : vector<1x16x16xf32>
    %c35 = arith.constant 35 : index
    %404 = memref.load %arg4[%c35] : memref<72xf32, #tpu.memory_space<smem>>
    %405 = vector.broadcast %404 : f32 to vector<1x16x16xf32>
    %406 = arith.mulf %405, %395 : vector<1x16x16xf32>
    %407 = arith.addf %393, %406 : vector<1x16x16xf32>
    %c0_136 = arith.constant 0 : index
    %c4_137 = arith.constant 4 : index
    %c0_138 = arith.constant 0 : index
    %c0_139 = arith.constant 0 : index
    %408 = vector.load %arg7[%c0_136, %c4_137, %c0_138, %c0_139] : memref<1x8x18x16xf32, #tpu.memory_space<vmem>>, vector<1x1x16x16xf32>
    %409 = vector.shape_cast %408 : vector<1x1x16x16xf32> to vector<1x16x16xf32>
    %c36 = arith.constant 36 : index
    %410 = memref.load %arg4[%c36] : memref<72xf32, #tpu.memory_space<smem>>
    %411 = vector.broadcast %410 : f32 to vector<1x16x16xf32>
    %412 = arith.mulf %411, %409 : vector<1x16x16xf32>
    %413 = arith.addf %399, %412 : vector<1x16x16xf32>
    %c37 = arith.constant 37 : index
    %414 = memref.load %arg4[%c37] : memref<72xf32, #tpu.memory_space<smem>>
    %415 = vector.broadcast %414 : f32 to vector<1x16x16xf32>
    %416 = arith.mulf %415, %409 : vector<1x16x16xf32>
    %417 = arith.addf %403, %416 : vector<1x16x16xf32>
    %c38 = arith.constant 38 : index
    %418 = memref.load %arg4[%c38] : memref<72xf32, #tpu.memory_space<smem>>
    %419 = vector.broadcast %418 : f32 to vector<1x16x16xf32>
    %420 = arith.mulf %419, %409 : vector<1x16x16xf32>
    %421 = arith.addf %407, %420 : vector<1x16x16xf32>
    %c0_140 = arith.constant 0 : index
    %c4_141 = arith.constant 4 : index
    %c1_142 = arith.constant 1 : index
    %c0_143 = arith.constant 0 : index
    %422 = vector.load %arg7[%c0_140, %c4_141, %c1_142, %c0_143] : memref<1x8x18x16xf32, #tpu.memory_space<vmem>>, vector<1x1x16x16xf32>
    %423 = vector.shape_cast %422 : vector<1x1x16x16xf32> to vector<1x16x16xf32>
    %c39 = arith.constant 39 : index
    %424 = memref.load %arg4[%c39] : memref<72xf32, #tpu.memory_space<smem>>
    %425 = vector.broadcast %424 : f32 to vector<1x16x16xf32>
    %426 = arith.mulf %425, %423 : vector<1x16x16xf32>
    %427 = arith.addf %413, %426 : vector<1x16x16xf32>
    %c40 = arith.constant 40 : index
    %428 = memref.load %arg4[%c40] : memref<72xf32, #tpu.memory_space<smem>>
    %429 = vector.broadcast %428 : f32 to vector<1x16x16xf32>
    %430 = arith.mulf %429, %423 : vector<1x16x16xf32>
    %431 = arith.addf %417, %430 : vector<1x16x16xf32>
    %c41 = arith.constant 41 : index
    %432 = memref.load %arg4[%c41] : memref<72xf32, #tpu.memory_space<smem>>
    %433 = vector.broadcast %432 : f32 to vector<1x16x16xf32>
    %434 = arith.mulf %433, %423 : vector<1x16x16xf32>
    %435 = arith.addf %421, %434 : vector<1x16x16xf32>
    %c0_144 = arith.constant 0 : index
    %c4_145 = arith.constant 4 : index
    %c2_146 = arith.constant 2 : index
    %c0_147 = arith.constant 0 : index
    %436 = vector.load %arg7[%c0_144, %c4_145, %c2_146, %c0_147] : memref<1x8x18x16xf32, #tpu.memory_space<vmem>>, vector<1x1x16x16xf32>
    %437 = vector.shape_cast %436 : vector<1x1x16x16xf32> to vector<1x16x16xf32>
    %c42 = arith.constant 42 : index
    %438 = memref.load %arg4[%c42] : memref<72xf32, #tpu.memory_space<smem>>
    %439 = vector.broadcast %438 : f32 to vector<1x16x16xf32>
    %440 = arith.mulf %439, %437 : vector<1x16x16xf32>
    %441 = arith.addf %427, %440 : vector<1x16x16xf32>
    %c43 = arith.constant 43 : index
    %442 = memref.load %arg4[%c43] : memref<72xf32, #tpu.memory_space<smem>>
    %443 = vector.broadcast %442 : f32 to vector<1x16x16xf32>
    %444 = arith.mulf %443, %437 : vector<1x16x16xf32>
    %445 = arith.addf %431, %444 : vector<1x16x16xf32>
    %c44 = arith.constant 44 : index
    %446 = memref.load %arg4[%c44] : memref<72xf32, #tpu.memory_space<smem>>
    %447 = vector.broadcast %446 : f32 to vector<1x16x16xf32>
    %448 = arith.mulf %447, %437 : vector<1x16x16xf32>
    %449 = arith.addf %435, %448 : vector<1x16x16xf32>
    %c0_148 = arith.constant 0 : index
    %c5_149 = arith.constant 5 : index
    %c0_150 = arith.constant 0 : index
    %c0_151 = arith.constant 0 : index
    %450 = vector.load %arg7[%c0_148, %c5_149, %c0_150, %c0_151] : memref<1x8x18x16xf32, #tpu.memory_space<vmem>>, vector<1x1x16x16xf32>
    %451 = vector.shape_cast %450 : vector<1x1x16x16xf32> to vector<1x16x16xf32>
    %c45 = arith.constant 45 : index
    %452 = memref.load %arg4[%c45] : memref<72xf32, #tpu.memory_space<smem>>
    %453 = vector.broadcast %452 : f32 to vector<1x16x16xf32>
    %454 = arith.mulf %453, %451 : vector<1x16x16xf32>
    %455 = arith.addf %441, %454 : vector<1x16x16xf32>
    %c46 = arith.constant 46 : index
    %456 = memref.load %arg4[%c46] : memref<72xf32, #tpu.memory_space<smem>>
    %457 = vector.broadcast %456 : f32 to vector<1x16x16xf32>
    %458 = arith.mulf %457, %451 : vector<1x16x16xf32>
    %459 = arith.addf %445, %458 : vector<1x16x16xf32>
    %c47 = arith.constant 47 : index
    %460 = memref.load %arg4[%c47] : memref<72xf32, #tpu.memory_space<smem>>
    %461 = vector.broadcast %460 : f32 to vector<1x16x16xf32>
    %462 = arith.mulf %461, %451 : vector<1x16x16xf32>
    %463 = arith.addf %449, %462 : vector<1x16x16xf32>
    %c0_152 = arith.constant 0 : index
    %c5_153 = arith.constant 5 : index
    %c1_154 = arith.constant 1 : index
    %c0_155 = arith.constant 0 : index
    %464 = vector.load %arg7[%c0_152, %c5_153, %c1_154, %c0_155] : memref<1x8x18x16xf32, #tpu.memory_space<vmem>>, vector<1x1x16x16xf32>
    %465 = vector.shape_cast %464 : vector<1x1x16x16xf32> to vector<1x16x16xf32>
    %c48 = arith.constant 48 : index
    %466 = memref.load %arg4[%c48] : memref<72xf32, #tpu.memory_space<smem>>
    %467 = vector.broadcast %466 : f32 to vector<1x16x16xf32>
    %468 = arith.mulf %467, %465 : vector<1x16x16xf32>
    %469 = arith.addf %455, %468 : vector<1x16x16xf32>
    %c49 = arith.constant 49 : index
    %470 = memref.load %arg4[%c49] : memref<72xf32, #tpu.memory_space<smem>>
    %471 = vector.broadcast %470 : f32 to vector<1x16x16xf32>
    %472 = arith.mulf %471, %465 : vector<1x16x16xf32>
    %473 = arith.addf %459, %472 : vector<1x16x16xf32>
    %c50 = arith.constant 50 : index
    %474 = memref.load %arg4[%c50] : memref<72xf32, #tpu.memory_space<smem>>
    %475 = vector.broadcast %474 : f32 to vector<1x16x16xf32>
    %476 = arith.mulf %475, %465 : vector<1x16x16xf32>
    %477 = arith.addf %463, %476 : vector<1x16x16xf32>
    %c0_156 = arith.constant 0 : index
    %c5_157 = arith.constant 5 : index
    %c2_158 = arith.constant 2 : index
    %c0_159 = arith.constant 0 : index
    %478 = vector.load %arg7[%c0_156, %c5_157, %c2_158, %c0_159] : memref<1x8x18x16xf32, #tpu.memory_space<vmem>>, vector<1x1x16x16xf32>
    %479 = vector.shape_cast %478 : vector<1x1x16x16xf32> to vector<1x16x16xf32>
    %c51 = arith.constant 51 : index
    %480 = memref.load %arg4[%c51] : memref<72xf32, #tpu.memory_space<smem>>
    %481 = vector.broadcast %480 : f32 to vector<1x16x16xf32>
    %482 = arith.mulf %481, %479 : vector<1x16x16xf32>
    %483 = arith.addf %469, %482 : vector<1x16x16xf32>
    %c52 = arith.constant 52 : index
    %484 = memref.load %arg4[%c52] : memref<72xf32, #tpu.memory_space<smem>>
    %485 = vector.broadcast %484 : f32 to vector<1x16x16xf32>
    %486 = arith.mulf %485, %479 : vector<1x16x16xf32>
    %487 = arith.addf %473, %486 : vector<1x16x16xf32>
    %c53 = arith.constant 53 : index
    %488 = memref.load %arg4[%c53] : memref<72xf32, #tpu.memory_space<smem>>
    %489 = vector.broadcast %488 : f32 to vector<1x16x16xf32>
    %490 = arith.mulf %489, %479 : vector<1x16x16xf32>
    %491 = arith.addf %477, %490 : vector<1x16x16xf32>
    %c0_160 = arith.constant 0 : index
    %c6_161 = arith.constant 6 : index
    %c0_162 = arith.constant 0 : index
    %c0_163 = arith.constant 0 : index
    %492 = vector.load %arg7[%c0_160, %c6_161, %c0_162, %c0_163] : memref<1x8x18x16xf32, #tpu.memory_space<vmem>>, vector<1x1x16x16xf32>
    %493 = vector.shape_cast %492 : vector<1x1x16x16xf32> to vector<1x16x16xf32>
    %c54 = arith.constant 54 : index
    %494 = memref.load %arg4[%c54] : memref<72xf32, #tpu.memory_space<smem>>
    %495 = vector.broadcast %494 : f32 to vector<1x16x16xf32>
    %496 = arith.mulf %495, %493 : vector<1x16x16xf32>
    %497 = arith.addf %483, %496 : vector<1x16x16xf32>
    %c55 = arith.constant 55 : index
    %498 = memref.load %arg4[%c55] : memref<72xf32, #tpu.memory_space<smem>>
    %499 = vector.broadcast %498 : f32 to vector<1x16x16xf32>
    %500 = arith.mulf %499, %493 : vector<1x16x16xf32>
    %501 = arith.addf %487, %500 : vector<1x16x16xf32>
    %c56 = arith.constant 56 : index
    %502 = memref.load %arg4[%c56] : memref<72xf32, #tpu.memory_space<smem>>
    %503 = vector.broadcast %502 : f32 to vector<1x16x16xf32>
    %504 = arith.mulf %503, %493 : vector<1x16x16xf32>
    %505 = arith.addf %491, %504 : vector<1x16x16xf32>
    %c0_164 = arith.constant 0 : index
    %c6_165 = arith.constant 6 : index
    %c1_166 = arith.constant 1 : index
    %c0_167 = arith.constant 0 : index
    %506 = vector.load %arg7[%c0_164, %c6_165, %c1_166, %c0_167] : memref<1x8x18x16xf32, #tpu.memory_space<vmem>>, vector<1x1x16x16xf32>
    %507 = vector.shape_cast %506 : vector<1x1x16x16xf32> to vector<1x16x16xf32>
    %c57 = arith.constant 57 : index
    %508 = memref.load %arg4[%c57] : memref<72xf32, #tpu.memory_space<smem>>
    %509 = vector.broadcast %508 : f32 to vector<1x16x16xf32>
    %510 = arith.mulf %509, %507 : vector<1x16x16xf32>
    %511 = arith.addf %497, %510 : vector<1x16x16xf32>
    %c58 = arith.constant 58 : index
    %512 = memref.load %arg4[%c58] : memref<72xf32, #tpu.memory_space<smem>>
    %513 = vector.broadcast %512 : f32 to vector<1x16x16xf32>
    %514 = arith.mulf %513, %507 : vector<1x16x16xf32>
    %515 = arith.addf %501, %514 : vector<1x16x16xf32>
    %c59 = arith.constant 59 : index
    %516 = memref.load %arg4[%c59] : memref<72xf32, #tpu.memory_space<smem>>
    %517 = vector.broadcast %516 : f32 to vector<1x16x16xf32>
    %518 = arith.mulf %517, %507 : vector<1x16x16xf32>
    %519 = arith.addf %505, %518 : vector<1x16x16xf32>
    %c0_168 = arith.constant 0 : index
    %c6_169 = arith.constant 6 : index
    %c2_170 = arith.constant 2 : index
    %c0_171 = arith.constant 0 : index
    %520 = vector.load %arg7[%c0_168, %c6_169, %c2_170, %c0_171] : memref<1x8x18x16xf32, #tpu.memory_space<vmem>>, vector<1x1x16x16xf32>
    %521 = vector.shape_cast %520 : vector<1x1x16x16xf32> to vector<1x16x16xf32>
    %c60 = arith.constant 60 : index
    %522 = memref.load %arg4[%c60] : memref<72xf32, #tpu.memory_space<smem>>
    %523 = vector.broadcast %522 : f32 to vector<1x16x16xf32>
    %524 = arith.mulf %523, %521 : vector<1x16x16xf32>
    %525 = arith.addf %511, %524 : vector<1x16x16xf32>
    %c61 = arith.constant 61 : index
    %526 = memref.load %arg4[%c61] : memref<72xf32, #tpu.memory_space<smem>>
    %527 = vector.broadcast %526 : f32 to vector<1x16x16xf32>
    %528 = arith.mulf %527, %521 : vector<1x16x16xf32>
    %529 = arith.addf %515, %528 : vector<1x16x16xf32>
    %c62 = arith.constant 62 : index
    %530 = memref.load %arg4[%c62] : memref<72xf32, #tpu.memory_space<smem>>
    %531 = vector.broadcast %530 : f32 to vector<1x16x16xf32>
    %532 = arith.mulf %531, %521 : vector<1x16x16xf32>
    %533 = arith.addf %519, %532 : vector<1x16x16xf32>
    %c0_172 = arith.constant 0 : index
    %c7_173 = arith.constant 7 : index
    %c0_174 = arith.constant 0 : index
    %c0_175 = arith.constant 0 : index
    %534 = vector.load %arg7[%c0_172, %c7_173, %c0_174, %c0_175] : memref<1x8x18x16xf32, #tpu.memory_space<vmem>>, vector<1x1x16x16xf32>
    %535 = vector.shape_cast %534 : vector<1x1x16x16xf32> to vector<1x16x16xf32>
    %c63 = arith.constant 63 : index
    %536 = memref.load %arg4[%c63] : memref<72xf32, #tpu.memory_space<smem>>
    %537 = vector.broadcast %536 : f32 to vector<1x16x16xf32>
    %538 = arith.mulf %537, %535 : vector<1x16x16xf32>
    %539 = arith.addf %525, %538 : vector<1x16x16xf32>
    %c64 = arith.constant 64 : index
    %540 = memref.load %arg4[%c64] : memref<72xf32, #tpu.memory_space<smem>>
    %541 = vector.broadcast %540 : f32 to vector<1x16x16xf32>
    %542 = arith.mulf %541, %535 : vector<1x16x16xf32>
    %543 = arith.addf %529, %542 : vector<1x16x16xf32>
    %c65 = arith.constant 65 : index
    %544 = memref.load %arg4[%c65] : memref<72xf32, #tpu.memory_space<smem>>
    %545 = vector.broadcast %544 : f32 to vector<1x16x16xf32>
    %546 = arith.mulf %545, %535 : vector<1x16x16xf32>
    %547 = arith.addf %533, %546 : vector<1x16x16xf32>
    %c0_176 = arith.constant 0 : index
    %c7_177 = arith.constant 7 : index
    %c1_178 = arith.constant 1 : index
    %c0_179 = arith.constant 0 : index
    %548 = vector.load %arg7[%c0_176, %c7_177, %c1_178, %c0_179] : memref<1x8x18x16xf32, #tpu.memory_space<vmem>>, vector<1x1x16x16xf32>
    %549 = vector.shape_cast %548 : vector<1x1x16x16xf32> to vector<1x16x16xf32>
    %c66 = arith.constant 66 : index
    %550 = memref.load %arg4[%c66] : memref<72xf32, #tpu.memory_space<smem>>
    %551 = vector.broadcast %550 : f32 to vector<1x16x16xf32>
    %552 = arith.mulf %551, %549 : vector<1x16x16xf32>
    %553 = arith.addf %539, %552 : vector<1x16x16xf32>
    %c67 = arith.constant 67 : index
    %554 = memref.load %arg4[%c67] : memref<72xf32, #tpu.memory_space<smem>>
    %555 = vector.broadcast %554 : f32 to vector<1x16x16xf32>
    %556 = arith.mulf %555, %549 : vector<1x16x16xf32>
    %557 = arith.addf %543, %556 : vector<1x16x16xf32>
    %c68 = arith.constant 68 : index
    %558 = memref.load %arg4[%c68] : memref<72xf32, #tpu.memory_space<smem>>
    %559 = vector.broadcast %558 : f32 to vector<1x16x16xf32>
    %560 = arith.mulf %559, %549 : vector<1x16x16xf32>
    %561 = arith.addf %547, %560 : vector<1x16x16xf32>
    %c0_180 = arith.constant 0 : index
    %c7_181 = arith.constant 7 : index
    %c2_182 = arith.constant 2 : index
    %c0_183 = arith.constant 0 : index
    %562 = vector.load %arg7[%c0_180, %c7_181, %c2_182, %c0_183] : memref<1x8x18x16xf32, #tpu.memory_space<vmem>>, vector<1x1x16x16xf32>
    %563 = vector.shape_cast %562 : vector<1x1x16x16xf32> to vector<1x16x16xf32>
    %c69 = arith.constant 69 : index
    %564 = memref.load %arg4[%c69] : memref<72xf32, #tpu.memory_space<smem>>
    %565 = vector.broadcast %564 : f32 to vector<1x16x16xf32>
    %566 = arith.mulf %565, %563 : vector<1x16x16xf32>
    %567 = arith.addf %553, %566 : vector<1x16x16xf32>
    %c70 = arith.constant 70 : index
    %568 = memref.load %arg4[%c70] : memref<72xf32, #tpu.memory_space<smem>>
    %569 = vector.broadcast %568 : f32 to vector<1x16x16xf32>
    %570 = arith.mulf %569, %563 : vector<1x16x16xf32>
    %571 = arith.addf %557, %570 : vector<1x16x16xf32>
    %c71 = arith.constant 71 : index
    %572 = memref.load %arg4[%c71] : memref<72xf32, #tpu.memory_space<smem>>
    %573 = vector.broadcast %572 : f32 to vector<1x16x16xf32>
    %574 = arith.mulf %573, %563 : vector<1x16x16xf32>
    %575 = arith.addf %561, %574 : vector<1x16x16xf32>
    %cst_184 = arith.constant 0.000000e+00 : f32
    %576 = vector.broadcast %cst_184 : f32 to vector<1x16x1xf32>
    %577 = vector.extract_strided_slice %567 {offsets = [0, 0, 0], sizes = [1, 16, 15], strides = [1, 1, 1]} : vector<1x16x16xf32> to vector<1x16x15xf32>
    %578 = tpu.concatenate %576, %577 in 2 : vector<1x16x1xf32>, vector<1x16x15xf32> -> vector<1x16x16xf32>
    %c0_185 = arith.constant 0 : index
    %579 = memref.load %arg5[%c0_185] : memref<1xf32, #tpu.memory_space<smem>>
    %580 = vector.broadcast %579 : f32 to vector<1x16x16xf32>
    %581 = arith.addf %578, %580 : vector<1x16x16xf32>
    %582 = arith.addf %581, %571 : vector<1x16x16xf32>
    %583 = vector.extract_strided_slice %575 {offsets = [0, 0, 1], sizes = [1, 16, 15], strides = [1, 1, 1]} : vector<1x16x16xf32> to vector<1x16x15xf32>
    %cst_186 = arith.constant 0.000000e+00 : f32
    %584 = vector.broadcast %cst_186 : f32 to vector<1x16x1xf32>
    %585 = tpu.concatenate %583, %584 in 2 : vector<1x16x15xf32>, vector<1x16x1xf32> -> vector<1x16x16xf32>
    %586 = arith.addf %582, %585 : vector<1x16x16xf32>
    %c0_187 = arith.constant 0 : index
    %c0_188 = arith.constant 0 : index
    %c0_189 = arith.constant 0 : index
    %587 = vector.load %arg6[%c0_187, %c0_188, %c0_189] : memref<1x16x16xf32, #tpu.memory_space<vmem>>, vector<1x16x16xf32>
    tpu.vector_store %arg6[%c0_187, %c0_188, %c0_189], %586 {strides = array<i32>} : memref<1x16x16xf32, #tpu.memory_space<vmem>>, vector<1x16x16xf32>,
    return
  }
  func.func @transform_0(%arg0: i32) -> (i32, i32, i32, i32) {
    %c0_i32 = arith.constant 0 : i32
    %c0_i32_0 = arith.constant 0 : i32
    %c0_i32_1 = arith.constant 0 : i32
    %c0_i32_2 = arith.constant 0 : i32
    return %arg0, %c0_i32, %c0_i32_0, %c0_i32_1 : i32, i32, i32, i32
  }
  func.func @transform_1(%arg0: i32) -> i32 {
    %c0_i32 = arith.constant 0 : i32
    %c0_i32_0 = arith.constant 0 : i32
    return %c0_i32 : i32
  }
  func.func @transform_2(%arg0: i32) -> i32 {
    %c0_i32 = arith.constant 0 : i32
    %c0_i32_0 = arith.constant 0 : i32
    return %c0_i32 : i32
  }
  func.func @transform_3(%arg0: i32) -> i32 {
    %c0_i32 = arith.constant 0 : i32
    %c0_i32_0 = arith.constant 0 : i32
    return %c0_i32 : i32
  }
  func.func @transform_4(%arg0: i32) -> i32 {
    %c0_i32 = arith.constant 0 : i32
    %c0_i32_0 = arith.constant 0 : i32
    return %c0_i32 : i32
  }
  func.func @transform_5(%arg0: i32) -> (i32, i32, i32) {
    %c0_i32 = arith.constant 0 : i32
    %c0_i32_0 = arith.constant 0 : i32
    %c0_i32_1 = arith.constant 0 : i32
    return %arg0, %c0_i32, %c0_i32_0 : i32, i32, i32
  }
}

</mosaic_0001>

<bundles_post_ra>
// kernel: tpu_custom_call.1
= control target key start
LH: loop header
LB: loop body
LE: loop exit
PB: predicated region body
PF: predicated region fallthrough
CT: control target
= control target key end

     0   :  { %s2833_s0 = inlined_call_operand.hbm [shape: f32[2,4,16,16], index: 0, kind: input, shape index: {}]   ;;  %s2834_s1 = inlined_call_operand.vmem [shape: f32[32], index: 1, kind: input, shape index: {}]   ;;  %s2835_s2 = inlined_call_operand.vmem [shape: f32[8], index: 2, kind: input, shape index: {}]   ;;  %s2836_s3 = inlined_call_operand.vmem [shape: f32[72], index: 3, kind: input, shape index: {}]   ;;  %s2837_s4 = inlined_call_operand.<no memory space> [shape: f32[1], index: 4, kind: input, shape index: {}]   ;;  %s2838_s5 = inlined_call_operand.hbm [shape: f32[2,16,16], index: 5, kind: output, shape index: {}]  }
   0x1   :  { %2942 = sst [smem:[#allocation75_spill]] %s2833_s0 }
   0x2   :  { %2943 = sst [smem:[#allocation76_spill]] %s2834_s1 }
   0x3   :  { %2944 = sst [smem:[#allocation77_spill]] %s2835_s2 }
   0x4   :  { %2945 = sst [smem:[#allocation78_spill]] %s2836_s3 }
   0x5   :  { %2946 = sst [smem:[#allocation79_spill]] %s2838_s5 }
   0x6   :  { %10 = sst [smem:[#allocation3]] %s2837_s4 }
   0x7   :  { %11 = vsyncpa [#allocation5], 0 }
   0x8   :  { %13 = vsyncpa [#allocation5 + $0x1], 0 }
   0x9   :  { %14 = vsyncpa [#allocation7], 0 }
   0xa   :  { %15 = vsyncpa [#allocation10], 0 }
   0xb   :  { %16 = vsyncpa [#allocation6], 0 }
   0xc   :  { %18 = vsyncpa [#allocation6 + $0x1], 0  ;;  %s1581_s20 = smov 0   ;;  %s1583_s21 = smov 0  }
   0xd   :  { %s1585_s22 = smov 0   ;;  %s1587_s23 = smov 0  }
   0xe LB: > { %2947 = sst [smem:[#allocation17_spill]] %s1522_s20  ;;  %s1602_s4 = sadd.s32 4294967295, %s1534_s23   ;;  %s1534_s23 = sphi %s1587_s23, %s3127_s23   ;;  %s1530_s22 = sphi %s1585_s22, %s3130_s22   ;;  %s1526_s21 = sphi %s1583_s21, %s3129_s21   ;;  %s1522_s20 = sphi %s1581_s20, %s3128_s20  }
   0xf   : > { %2948 = sst [smem:[#allocation18_spill]] %s1526_s21  ;;  %s1170_s24 = sadd.s32 4294967294, %s1534_s23  }
  0x10   : > { %2949 = sst [smem:[#allocation19_spill]] %s1530_s22  ;;  %p44_p0 = scmp.ne.s32.totalorder %s1526_s21, %s1522_s20 }
  0x11   : > { %2950 = sst [smem:[#allocation20_spill]] %s1534_s23  ;;  %p2839_p1 = scmp.eq.s32.totalorder %s1602_s4, 0 }
  0x12   : > { %2951 = sst [smem:[#allocation21_spill]] %s1602_s4  ;;  %p158_p3 = scmp.eq.s32.totalorder %s1170_s24, 1 }
  0x13   : > { %p1611_p4 = por %p2839_p1, %p44_p0  ;;  %p1171_p5 = scmp.ge.s32.totalorder %s1534_s23, 1 }
  0x14   : > { %p1616_p6 = por %p158_p3, %p44_p0  ;;  %p165_p7 = scmp.lt.s32.totalorder %s1534_s23, 3 }
  0x15   : > { %s2952_s25 = scalar_select %p1611_p4, 1, 0 }
  0x16   : > { %s2953_s26 = scalar_select %p1616_p6, 1, 0 }
  0x17   : > { %s2955_s2 = sld [smem:[#allocation77_spill]]  ;;  %p1624_p8 = pnand %p1171_p5, %p165_p7 }
  0x18   : > { %2954 = sst [smem:[#allocation22_spill]] %s2953_s26  ;;  %s2957_s1 = sld [smem:[#allocation76_spill]] }
  0x19   : > { %s2956_s30 = scalar_select %p1624_p8, 1, 0 }
  0x1a   : > { %p1317_p10 = pneg %p1624_p8  ;;  %s2959_s3 = sld [smem:[#allocation78_spill]] }
  0x1c   : > { %p1636_p11 = pnand %p1317_p10, %p2839_p1 }
  0x1d   : > { %s189_s29 = sshll.u32 %s2955_s2, 4  ;;  %s190_s29 = int_to_ptr.vmem [resolvable:$true] %s189_s29 }
  0x1e   : > { %s178_s8 = sshll.u32 %s2957_s1, 4  ;;  %s1385_s13 = scalar_lea.vmem %s190_s29, 16  ;;  %s179_s8 = int_to_ptr.vmem [resolvable:$true] %s178_s8 }
  0x1f   : > { %p1386_p12 = scmp.ne.s32.totalorder %s190_s29, %s1385_s13  ;;  %p1387_p13 = pneg %p1636_p11 }
  0x20   : > { %s200_s12 = sshll.u32 %s2959_s3, 4  ;;  %p1393_p5 = scmp.lt.s32.totalorder %s190_s29, %s190_s29  ;;  %s1643_s12 = int_to_ptr.vmem [resolvable:$true] %s200_s12 }
  0x21   : > { %p1388_p0 = pnand %p1387_p13, %p1386_p12  ;;  %p1394_p7 = scmp.lt.s32.totalorder %s1385_s13, %s1385_s13 }
  0x23   : > { %p1389_p3 = pneg %p1388_p0  ;;  %p1395_p10 = por %p1394_p7, %p1393_p5 }
  0x25   : > { %p1396_p9 = pnand %p1395_p10, %p1389_p3 }
  0x27   : > { %1399 = shalt.err (!%p1396_p9)
}
  0x28   : > { %s1536_s14 = smov [#allocation9]   ;;  %s1400_s15 = scalar_lea.vmem %s179_s8, 16 }
  0x29   : > { %1323 = dma.vmem_to_smem (!%p1636_p11), %s190_s29, 16, %s1536_s14, [#allocation10]  }
  0x2a   : > { %p1401_p1 = scmp.ne.s32.totalorder %s179_s8, %s1400_s15  ;;  %p1408_p4 = scmp.lt.s32.totalorder %s179_s8, %s179_s8 }
  0x2b   : > { %p1409_p8 = scmp.lt.s32.totalorder %s1400_s15, %s1400_s15 }
  0x2c   : > { %p1403_p2 = pnand %p1401_p1, %p1387_p13 }
  0x2d   : > { %p1410_p12 = por %p1409_p8, %p1408_p4 }
  0x2e   : > { %p1404_p6 = pneg %p1403_p2 }
  0x30   : > { %p1411_p0 = pnand %p1410_p12, %p1404_p6 }
  0x32   : > { %1414 = shalt.err (!%p1411_p0)
}
  0x33   : > { %s1537_s16 = smov [#allocation8]   ;;  %s1415_s17 = scalar_lea.vmem %s1643_s12, 16 }
  0x34   : > { %1320 = dma.vmem_to_smem (!%p1636_p11), %s179_s8, 16, %s1537_s16, [#allocation7]  }
  0x35   : > { %p1416_p9 = scmp.ne.s32.totalorder %s1643_s12, %s1415_s17  ;;  %p1423_p2 = scmp.lt.s32.totalorder %s1643_s12, %s1643_s12 }
  0x36   : > { %p1424_p5 = scmp.lt.s32.totalorder %s1415_s17, %s1415_s17 }
  0x37   : > { %p1418_p3 = pnand %p1416_p9, %p1387_p13 }
  0x38   : > { %p1425_p4 = por %p1424_p5, %p1423_p2 }
  0x39   : > { %p1419_p1 = pneg %p1418_p3 }
  0x3b   : > { %p1426_p6 = pnand %p1425_p4, %p1419_p1 }
  0x3d   : > { %1429 = shalt.err (!%p1426_p6)
}
  0x3e   : > { %s1538_s18 = smov [#allocation11]   ;;  %s1668_s19 = sadd.s32 1, %s1534_s23  }
  0x3f   : > { %1326 = dma.vmem_to_smem (!%p1636_p11), %s1643_s12, 16, %s1538_s18, [#allocation10]  }
  0x40   : > { %2960 = sst [smem:[#allocation23_spill]] %s1668_s19  ;;  %s28_s24 = ssub.s32 %s1534_s23, %s1668_s19 }
  0x41   : > { %s31_s27 = sadd.s32 1, %s1530_s22  ;;  %p29_p8 = scmp.eq.s32.totalorder %s28_s24, 0 }
  0x42   : > { %p38_p13 = scmp.ne.s32.totalorder %s1530_s22, %s1526_s21  ;;  %p39_p7 = scmp.eq.s32.totalorder %s1534_s23, 0 }
  0x43   : > { %p1338_p10 = scmp.lt.s32.totalorder %s1534_s23, 2  ;;  %p2962_p0 = scmp.eq.s32.totalorder %s1602_s4, 1 }
  0x44   : > { %s1678_s28 = scalar_select %p29_p8, %s1530_s22, %s31_s27  }
  0x45   : > { %p40_p12 = por %p39_p7, %p38_p13  ;;  %p1682_p9 = por %p2962_p0, %p38_p13 }
  0x46   : > { %2961 = sst [smem:[#allocation24_spill]] %s1678_s28  ;;  %s214_s6 = sand.u32 1, %s1530_s22  }
  0x47   : > { %s2963_s29 = scalar_select %p1682_p9, 1, 0 }
  0x48   : > { %s1299_s7 = sshll.u32 %s1534_s23, 10  ;;  %s1176_s8 = sshll.u32 %s214_s6, 6 }
  0x49   : > { %2964 = sst [smem:[#allocation25_spill]] %s2963_s29  ;;  %s2965_s0 = sld [smem:[#allocation75_spill]] }
  0x4a   : > { %s218_s12 = scalar_lea.vmem [#allocation4], %s1176_s8  ;;  %p1693_p11 = pnand %p1338_p10, %p40_p12 }
  0x4b   : > { %s225_s13 = sshll.u32 %s218_s12, 4  ;;  %s1699_s15 = scalar_lea.sflag [#allocation5], %s214_s6  ;;  %s1697_s13 = int_to_ptr.vmem [resolvable:$true] %s225_s13 }
  0x4c   : > { %p1432_p1 = pneg %p1693_p11 }
  0x4f   : > { %s1691_s11 = scalar_lea.hbm %s2965_s0, %s1299_s7  ;;  %s1435_s24 = scalar_lea.hbm %s2965_s0, 2048 }
  0x50   : > { %s1430_s16 = scalar_lea.hbm %s1691_s11, 1024  ;;  %p1436_p4 = scmp.lt.u32.totalorder %s1691_s11, %s2965_s0 }
  0x51   : > { %p1431_p3 = scmp.ne.s32.totalorder %s1691_s11, %s1430_s16  ;;  %p1437_p6 = scmp.lt.u32.totalorder %s1435_s24, %s1430_s16 }
  0x52   : > { %p1439_p13 = scmp.lt.u32.totalorder %s1430_s16, %s1691_s11 }
  0x53   : > { %p1433_p2 = pnand %p1432_p1, %p1431_p3  ;;  %p1438_p8 = por %p1437_p6, %p1436_p4 }
  0x55   : > { %p1434_p5 = pneg %p1433_p2  ;;  %p1440_p7 = por %p1439_p13, %p1438_p8 }
  0x57   : > { %p1441_p10 = pnand %p1440_p7, %p1434_p5 }
  0x59   : > { %1444 = shalt.err (!%p1441_p10)
}
  0x5a   : > { %s1445_s6 = scalar_lea.vmem %s1697_s13, 1024  ;;  %s1539_s8 = smov [#allocation4]  }
  0x5b   : > { %p1446_p12 = scmp.ne.s32.totalorder %s1697_s13, %s1445_s6  ;;  %s1450_s9 = sshll.u32 %s1539_s8, 4  ;;  %s1451_s9 = int_to_ptr.vmem [resolvable:$false] %s1450_s9 }
  0x5c   : > { %s1452_s10 = scalar_lea.vmem %s1451_s9, 2048  ;;  %p1453_p2 = scmp.lt.s32.totalorder %s1697_s13, %s1451_s9 }
  0x5d   : > { %p1448_p0 = pnand %p1446_p12, %p1432_p1  ;;  %p1454_p4 = scmp.lt.s32.totalorder %s1452_s10, %s1445_s6 }
  0x5f   : > { %p1449_p3 = pneg %p1448_p0  ;;  %p1455_p6 = por %p1454_p4, %p1453_p2 }
  0x61   : > { %p1456_p8 = pnand %p1455_p6, %p1449_p3 }
  0x63   : > { %1459 = shalt.err (!%p1456_p8)
}
  0x64   : > { %s1540_s12 = smov 128   ;;  %s1541_s16 = smov 8  }
  0x65   : > { %1330 = dma.hbm_to_vmem [thread:$0]  (!%p1693_p11), %s1691_s11, 1024, %s1697_s13, %s1699_s15, %s1540_s12, %s1540_s12, %s1541_s16  }
  0x66   : > { %p2967_p1 = scmp.ne.s32.totalorder %s2956_s30, 0 }
  0x68   : > { %237 = sbr.rel (%p2967_p1) target bundleno = 400 (0x190), region = 40 }
  0x6f   : > { %s1730_s17 = sand.u32 1, %s1526_s21   ;;  %p2969_p5 = scmp.ne.s32.totalorder %s2952_s25, 0 }
  0x70   : > { %2968 = sst [smem:[#allocation26_spill]] %s1730_s17  ;;  %s1180_s18 = sshll.u32 %s1730_s17, 6 }
  0x71   : > { %s240_s24 = scalar_lea.sflag [#allocation5], %s1730_s17  ;;  %s1734_s27 = scalar_lea.vmem [#allocation4], %s1180_s18 }
  0x72   : > { %1505 = dma.done.wait (%p2969_p5), %s240_s24, 1024  }
  0x73   : > { %1507 = vsyncadd (%p2969_p5), %s240_s24, 4294966272  ;;  %p2970_p11 = scmp.eq.s32.totalorder %s1602_s4, 0 }
  0x75   : > { %1509 = dma.done.wait (%p2970_p11), [#allocation7], 16   ;;  %p2971_p13 = pmov %p2970_p11 }
  0x76   : > { %p2972_p7 = pmov %p2970_p11 }
  0x77   : > { %1511 = vsyncadd (%p2971_p13), [#allocation7], 4294967280 }
  0x78   : > { %1513 = dma.done.wait (%p2972_p7), [#allocation10], 32   ;;  %p2973_p10 = pmov %p2972_p7 }
  0x7a   : > { %1515 = vsyncadd (%p2973_p10), [#allocation10], 4294967264 }
  0x7b   : > { %260 = sfence }
  0x7c   : > { %vm283_vm0 = vcmask 122880   ;;  %v1542_v0 = vmov 0.0   ;;  %s308_s25 = sld [smem:[#allocation8]]  ;;  %s1185_s11 = sld [smem:[#allocation8 + $0x1]]  ;;  %v1775_v1 = vld [vmem:[%s1734_s27] sm:$0xff]  ;;  %v1778_v2 = vld [vmem:[%s1734_s27 + $0x8] sm:$0xff] }
  0x7d   : > { %284 = vst.msk [vmem:[#allocation2] sm:$0x1] %vm283_vm0, %v1542_v0  ;;  %285 = vst.msk [vmem:[#allocation2 + $0x18] sm:$0x1] %vm283_vm0, %v1542_v0  ;;  %s1764_s30 = sld [smem:[#allocation9]]  ;;  %s1766_s13 = sld [smem:[#allocation8 + $0x2]] }
  0x7e   : > { %286 = vst.msk [vmem:[#allocation2 + $0x30] sm:$0x1] %vm283_vm0, %v1542_v0  ;;  %287 = vst.msk [vmem:[#allocation2 + $0x48] sm:$0x1] %vm283_vm0, %v1542_v0  ;;  %s1768_s14 = sld [smem:[#allocation8 + $0x3]]  ;;  %s1770_s15 = sld [smem:[#allocation8 + $0x4]] }
  0x7f   : > { %288 = vst.msk [vmem:[#allocation2 + $0x60] sm:$0x1] %vm283_vm0, %v1542_v0  ;;  %289 = vst.msk [vmem:[#allocation2 + $0x78] sm:$0x1] %vm283_vm0, %v1542_v0  ;;  %s1772_s7 = sld [smem:[#allocation9 + $0x1]]  ;;  %s1780_s6 = sld [smem:[#allocation8 + $0x5]] }
  0x80   : > { %290 = vst.msk [vmem:[#allocation2 + $0x90] sm:$0x1] %vm283_vm0, %v1542_v0  ;;  %291 = vst.msk [vmem:[#allocation2 + $0xa8] sm:$0x1] %vm283_vm0, %v1542_v0  ;;  %s1782_s8 = sld [smem:[#allocation8 + $0x6]]  ;;  %v1785_v3 = vld [vmem:[%s1734_s27 + $0x10] sm:$0xff] }
  0x81   : > { %292 = vst.msk [vmem:[#allocation2 + $0x11] sm:$0x1] %vm283_vm0, %v1542_v0  ;;  %293 = vst.msk [vmem:[#allocation2 + $0x29] sm:$0x1] %vm283_vm0, %v1542_v0  ;;  %v1788_v4 = vld [vmem:[%s1734_s27 + $0x18] sm:$0xff]  ;;  %s1790_s9 = sld [smem:[#allocation8 + $0x7]] }
  0x82   : > { %294 = vst.msk [vmem:[#allocation2 + $0x41] sm:$0x1] %vm283_vm0, %v1542_v0  ;;  %295 = vst.msk [vmem:[#allocation2 + $0x59] sm:$0x1] %vm283_vm0, %v1542_v0  ;;  %s1792_s10 = sld [smem:[#allocation8 + $0x8]]  ;;  %v1795_v5 = vld [vmem:[%s1734_s27 + $0x20] sm:$0xff]  ;;  %v309_v7 = vstv %s308_s25  ;;  %v317_v13 = vstv %s1185_s11 }
  0x83   : > { %296 = vst.msk [vmem:[#allocation2 + $0x71] sm:$0x1] %vm283_vm0, %v1542_v0  ;;  %297 = vst.msk [vmem:[#allocation2 + $0x89] sm:$0x1] %vm283_vm0, %v1542_v0  ;;  %v1798_v6 = vld [vmem:[%s1734_s27 + $0x28] sm:$0xff]  ;;  %vm334_vm1 = vcmask 130048   ;;  %v310_v10 = vmul.f32 %v309_v7, %v1775_v1  ;;  %v311_v11 = vmul.f32 %v309_v7, %v1778_v2  ;;  %v313_v12 = vstv %s1764_s30 }
  0x84   : > { %298 = vst.msk [vmem:[#allocation2 + $0xa1] sm:$0x1] %vm283_vm0, %v1542_v0  ;;  %299 = vst.msk [vmem:[#allocation2 + $0xb9] sm:$0x1] %vm283_vm0, %v1542_v0  ;;  %v1801_v8 = vld [vmem:[%s1734_s27 + $0x30] sm:$0xff]  ;;  %v1804_v9 = vld [vmem:[%s1734_s27 + $0x38] sm:$0xff]  ;;  %v318_v14 = vmul.f32 %v317_v13, %v1785_v3  ;;  %v319_v15 = vmul.f32 %v317_v13, %v1788_v4  ;;  %v323_v16 = vstv %s1766_s13  ;;  %v329_v17 = vstv %s1768_s14 }
  0x85   : > { %s1813_s12 = sld [smem:[#allocation9 + $0x2]]  ;;  %s1815_s16 = sld [smem:[#allocation8 + $0x9]]  ;;  %v314_v18 = vadd.f32 %v313_v12, %v310_v10  ;;  %v315_v19 = vadd.f32 %v313_v12, %v311_v11  ;;  %v324_v20 = vmul.f32 %v323_v16, %v1795_v5  ;;  %v325_v21 = vmul.f32 %v323_v16, %v1798_v6 }
  0x86   : > { %s1819_s18 = sld [smem:[#allocation8 + $0xa]]  ;;  %s1821_s24 = sld [smem:[#allocation8 + $0xb]]  ;;  %v330_v22 = vmul.f32 %v329_v17, %v1801_v8  ;;  %v331_v23 = vmul.f32 %v329_v17, %v1804_v9  ;;  %v338_v24 = vstv %s1770_s15  ;;  %v342_v25 = vstv %s1772_s7 }
  0x87   : > { %v320_v26 = vadd.f32 %v318_v14, %v314_v18  ;;  %v321_v27 = vadd.f32 %v319_v15, %v315_v19  ;;  %v339_v28 = vmul.f32 %v338_v24, %v1775_v1  ;;  %v340_v29 = vmul.f32 %v338_v24, %v1778_v2  ;;  %s1833_s27 = sld [smem:[#allocation8 + $0xc]]  ;;  %s1835_s25 = sld [smem:[#allocation9 + $0x3]] }
  0x88   : > { %v346_v30 = vstv %s1780_s6  ;;  %v352_v31 = vstv %s1782_s8  ;;  %v358_v32 = vstv %s1790_s9  ;;  %v367_v33 = vstv %s1792_s10  ;;  %s1841_s30 = sld [smem:[#allocation8 + $0xd]]  ;;  %s1843_s11 = sld [smem:[#allocation8 + $0xe]] }
  0x89   : > { %v326_v34 = vadd.f32 %v324_v20, %v320_v26  ;;  %v327_v35 = vadd.f32 %v325_v21, %v321_v27  ;;  %v343_v36 = vadd.f32 %v342_v25, %v339_v28  ;;  %v344_v37 = vadd.f32 %v342_v25, %v340_v29  ;;  %s1855_s13 = sld [smem:[#allocation8 + $0xf]]  ;;  %s1857_s14 = sld [smem:[#allocation8 + $0x10]] }
  0x8a   : > { %v347_v38 = vmul.f32 %v346_v30, %v1785_v3  ;;  %v348_v39 = vmul.f32 %v346_v30, %v1788_v4  ;;  %v353_v40 = vmul.f32 %v352_v31, %v1795_v5  ;;  %v354_v41 = vmul.f32 %v352_v31, %v1798_v6  ;;  %s1863_s15 = sld [smem:[#allocation9 + $0x4]]  ;;  %s1865_s7 = sld [smem:[#allocation8 + $0x11]] }
  0x8b   : > { %v332_v42 = vadd.f32 %v330_v22, %v326_v34  ;;  %v333_v43 = vadd.f32 %v331_v23, %v327_v35  ;;  %v359_v44 = vmul.f32 %v358_v32, %v1801_v8  ;;  %v360_v45 = vmul.f32 %v358_v32, %v1804_v9  ;;  %s1871_s6 = sld [smem:[#allocation8 + $0x12]]  ;;  %s1873_s8 = sld [smem:[#allocation8 + $0x13]] }
  0x8c   : > { %v349_v46 = vadd.f32 %v347_v38, %v343_v36  ;;  %v350_v47 = vadd.f32 %v348_v39, %v344_v37  ;;  %v368_v48 = vmul.f32 %v367_v33, %v1775_v1  ;;  %v369_v49 = vmul.f32 %v367_v33, %v1778_v2  ;;  %s1883_s9 = sld [smem:[#allocation8 + $0x14]]  ;;  %s1885_s10 = sld [smem:[#allocation9 + $0x5]] }
  0x8d   : > { %335 = vst.msk [vmem:[#allocation2 + $0x1] sm:$0xff] %vm334_vm1, %v332_v42  ;;  %336 = vst.msk [vmem:[#allocation2 + $0x9] sm:$0xff] %vm334_vm1, %v333_v43  ;;  %v371_v50 = vstv %s1813_s12  ;;  %v375_v51 = vstv %s1815_s16  ;;  %v381_v52 = vstv %s1819_s18  ;;  %v387_v53 = vstv %s1821_s24  ;;  %s1889_s12 = sld [smem:[#allocation8 + $0x15]]  ;;  %s1891_s16 = sld [smem:[#allocation8 + $0x16]] }
  0x8e   : > { %v355_v54 = vadd.f32 %v353_v40, %v349_v46  ;;  %v356_v55 = vadd.f32 %v354_v41, %v350_v47  ;;  %v372_v56 = vadd.f32 %v371_v50, %v368_v48  ;;  %v373_v57 = vadd.f32 %v371_v50, %v369_v49  ;;  %s1903_s18 = sld [smem:[#allocation8 + $0x17]]  ;;  %s1905_s24 = sld [smem:[#allocation8 + $0x18]] }
  0x8f   : > { %v376_v58 = vmul.f32 %v375_v51, %v1785_v3  ;;  %v377_v59 = vmul.f32 %v375_v51, %v1788_v4  ;;  %v382_v60 = vmul.f32 %v381_v52, %v1795_v5  ;;  %v383_v61 = vmul.f32 %v381_v52, %v1798_v6  ;;  %s2033_s0 = sld [smem:[#allocation11 + $0x30]]  ;;  %s2042_s1 = sld [smem:[#allocation11 + $0x33]] }
  0x90   : > { %v361_v62 = vadd.f32 %v359_v44, %v355_v54  ;;  %v362_v63 = vadd.f32 %v360_v45, %v356_v55  ;;  %v388_v0 = vmul.f32 %v387_v53, %v1801_v8  ;;  %v389_v7 = vmul.f32 %v387_v53, %v1804_v9  ;;  %s2044_s2 = sld [smem:[#allocation11 + $0x36]]  ;;  %s2051_s3 = sld [smem:[#allocation11 + $0x39]] }
  0x91   : > { %v378_v10 = vadd.f32 %v376_v58, %v372_v56  ;;  %v379_v11 = vadd.f32 %v377_v59, %v373_v57  ;;  %v396_v12 = vstv %s1833_s27  ;;  %v400_v13 = vstv %s1835_s25  ;;  %s1909_s27 = sld [smem:[#allocation9 + $0x6]]  ;;  %s1911_s25 = sld [smem:[#allocation8 + $0x19]] }
  0x92   : > { %364 = vst.msk [vmem:[#allocation2 + $0x19] sm:$0xff] %vm334_vm1, %v361_v62  ;;  %365 = vst.msk [vmem:[#allocation2 + $0x21] sm:$0xff] %vm334_vm1, %v362_v63  ;;  %v397_v14 = vmul.f32 %v396_v12, %v1775_v1  ;;  %v398_v15 = vmul.f32 %v396_v12, %v1778_v2  ;;  %v404_v16 = vstv %s1841_s30  ;;  %v410_v17 = vstv %s1843_s11  ;;  %s1919_s30 = sld [smem:[#allocation8 + $0x1a]]  ;;  %s1921_s11 = sld [smem:[#allocation8 + $0x1b]] }
  0x93   : > { %v384_v18 = vadd.f32 %v382_v60, %v378_v10  ;;  %v385_v19 = vadd.f32 %v383_v61, %v379_v11  ;;  %v405_v20 = vmul.f32 %v404_v16, %v1785_v3  ;;  %v406_v21 = vmul.f32 %v404_v16, %v1788_v4  ;;  %s2053_s28 = sld [smem:[#allocation11 + $0x3c]]  ;;  %s2058_s22 = sld [smem:[#allocation11 + $0x3f]] }
  0x94   : > { %v401_v22 = vadd.f32 %v400_v13, %v397_v14  ;;  %v402_v23 = vadd.f32 %v400_v13, %v398_v15  ;;  %v411_v24 = vmul.f32 %v410_v17, %v1795_v5  ;;  %v412_v25 = vmul.f32 %v410_v17, %v1798_v6  ;;  %s2060_s21 = sld [smem:[#allocation11 + $0x42]]  ;;  %s2070_s19 = sld [smem:[#allocation11 + $0x45]] }
  0x95   : > { %v390_v26 = vadd.f32 %v388_v0, %v384_v18  ;;  %v391_v27 = vadd.f32 %v389_v7, %v385_v19  ;;  %v416_v28 = vstv %s1855_s13  ;;  %v425_v29 = vstv %s1857_s14  ;;  %s1935_s13 = sld [smem:[#allocation8 + $0x1c]]  ;;  %s1937_s14 = sld [smem:[#allocation9 + $0x7]] }
  0x96   : > { %v407_v30 = vadd.f32 %v405_v20, %v401_v22  ;;  %v408_v31 = vadd.f32 %v406_v21, %v402_v23  ;;  %v417_v32 = vmul.f32 %v416_v28, %v1801_v8  ;;  %v418_v33 = vmul.f32 %v416_v28, %v1804_v9  ;;  %2980 = sst [smem:[#allocation33_spill]] %s2033_s0  ;;  %s2072_s23 = sld [smem:[#allocation11 + $0x2]] }
  0x97   : > { %393 = vst.msk [vmem:[#allocation2 + $0x31] sm:$0xff] %vm334_vm1, %v390_v26  ;;  %394 = vst.msk [vmem:[#allocation2 + $0x39] sm:$0xff] %vm334_vm1, %v391_v27  ;;  %v426_v34 = vmul.f32 %v425_v29, %v1775_v1  ;;  %v427_v35 = vmul.f32 %v425_v29, %v1778_v2  ;;  %v429_v36 = vstv %s1863_s15  ;;  %v433_v37 = vstv %s1865_s7  ;;  %s1939_s15 = sld [smem:[#allocation8 + $0x1d]]  ;;  %s1941_s7 = sld [smem:[#allocation8 + $0x1e]] }
  0x98   : > { %v413_v38 = vadd.f32 %v411_v24, %v407_v30  ;;  %v414_v39 = vadd.f32 %v412_v25, %v408_v31  ;;  %v434_v40 = vmul.f32 %v433_v37, %v1785_v3  ;;  %v435_v41 = vmul.f32 %v433_v37, %v1788_v4  ;;  %2982 = sst [smem:[#allocation35_spill]] %s2042_s1  ;;  %s2083_s26 = sld [smem:[#allocation11 + $0x5]] }
  0x99   : > { %v430_v42 = vadd.f32 %v429_v36, %v426_v34  ;;  %v431_v43 = vadd.f32 %v429_v36, %v427_v35  ;;  %v439_v44 = vstv %s1871_s6  ;;  %v445_v45 = vstv %s1873_s8  ;;  %s1955_s6 = sld [smem:[#allocation8 + $0x1f]]  ;;  %s1957_s8 = sld [smem:[#allocation11]] }
  0x9a   : > { %v419_v46 = vadd.f32 %v417_v32, %v413_v38  ;;  %v420_v47 = vadd.f32 %v418_v33, %v414_v39  ;;  %v440_v48 = vmul.f32 %v439_v44, %v1795_v5  ;;  %v441_v49 = vmul.f32 %v439_v44, %v1798_v6  ;;  %2983 = sst [smem:[#allocation36_spill]] %s2044_s2  ;;  %s2085_s20 = sld [smem:[#allocation11 + $0x8]] }
  0x9b   : > { %v436_v50 = vadd.f32 %v434_v40, %v430_v42  ;;  %v437_v51 = vadd.f32 %v435_v41, %v431_v43  ;;  %v446_v52 = vmul.f32 %v445_v45, %v1801_v8  ;;  %v447_v53 = vmul.f32 %v445_v45, %v1804_v9  ;;  %2987 = sst [smem:[#allocation40_spill]] %s2058_s22  ;;  %s2098_s29 = sld [smem:[#allocation11 + $0xe]] }
  0x9c   : > { %422 = vst.msk [vmem:[#allocation2 + $0x49] sm:$0xff] %vm334_vm1, %v419_v46  ;;  %423 = vst.msk [vmem:[#allocation2 + $0x51] sm:$0xff] %vm334_vm1, %v420_v47  ;;  %v454_v54 = vstv %s1883_s9  ;;  %v458_v55 = vstv %s1885_s10  ;;  %v462_v56 = vstv %s1889_s12  ;;  %v468_v57 = vstv %s1891_s16  ;;  %s1961_s9 = sld [smem:[#allocation11 + $0x3]]  ;;  %s1965_s10 = sld [smem:[#allocation11 + $0x6]] }
  0x9d   : > { %v442_v58 = vadd.f32 %v440_v48, %v436_v50  ;;  %v443_v59 = vadd.f32 %v441_v49, %v437_v51  ;;  %v455_v60 = vmul.f32 %v454_v54, %v1775_v1  ;;  %v456_v61 = vmul.f32 %v454_v54, %v1778_v2  ;;  %s1967_s12 = sld [smem:[#allocation11 + $0x9]]  ;;  %s1973_s16 = sld [smem:[#allocation11 + $0xc]] }
  0x9e   : > { %v463_v62 = vmul.f32 %v462_v56, %v1785_v3  ;;  %v464_v63 = vmul.f32 %v462_v56, %v1788_v4  ;;  %v469_v0 = vmul.f32 %v468_v57, %v1795_v5  ;;  %v470_v7 = vmul.f32 %v468_v57, %v1798_v6  ;;  %v1999_v56 = vld [vmem:[#allocation2 + $0x2] sm:$0xff]  ;;  %2989 = sst [smem:[#allocation42_spill]] %s2070_s19  ;;  %s2096_s5 = sld [smem:[#allocation11 + $0xb]] }
  0x9f   : > { %v448_v10 = vadd.f32 %v446_v52, %v442_v58  ;;  %v449_v11 = vadd.f32 %v447_v53, %v443_v59  ;;  %v459_v12 = vadd.f32 %v458_v55, %v455_v60  ;;  %v460_v13 = vadd.f32 %v458_v55, %v456_v61  ;;  %v1991_v52 = vld [vmem:[#allocation2] sm:$0xff]  ;;  %v2007_v59 = vld [vmem:[#allocation2 + $0x18] sm:$0xff]  ;;  %2990 = sst [smem:[#allocation43_spill]] %s2072_s23  ;;  %s2112_s4 = sld [smem:[#allocation11 + $0x11]] }
  0xa0   : > { %v474_v14 = vstv %s1903_s18  ;;  %v483_v15 = vstv %s1905_s24  ;;  %v487_v16 = vstv %s1909_s27  ;;  %v491_v17 = vstv %s1911_s25  ;;  %s1975_s18 = sld [smem:[#allocation11 + $0xf]]  ;;  %s1983_s24 = sld [smem:[#allocation11 + $0x12]] }
  0xa1   : > { %451 = vst.msk [vmem:[#allocation2 + $0x61] sm:$0xff] %vm334_vm1, %v448_v10  ;;  %452 = vst.msk [vmem:[#allocation2 + $0x69] sm:$0xff] %vm334_vm1, %v449_v11  ;;  %v465_v18 = vadd.f32 %v463_v62, %v459_v12  ;;  %v466_v19 = vadd.f32 %v464_v63, %v460_v13  ;;  %v475_v20 = vmul.f32 %v474_v14, %v1801_v8  ;;  %v497_v28 = vstv %s1919_s30  ;;  %s1987_s27 = sld [smem:[#allocation11 + $0x15]]  ;;  %s1993_s25 = sld [smem:[#allocation11 + $0x18]]  ;;  %v2038_v11 = vld [vmem:[#allocation2 + $0x19] sm:$0xff] }
  0xa2   : > { %v476_v21 = vmul.f32 %v474_v14, %v1804_v9  ;;  %v484_v22 = vmul.f32 %v483_v15, %v1775_v1  ;;  %v485_v23 = vmul.f32 %v483_v15, %v1778_v2  ;;  %v492_v24 = vmul.f32 %v491_v17, %v1785_v3  ;;  %s2001_s30 = sld [smem:[#allocation11 + $0x1b]]  ;;  %2981 = vst [vmem:[#allocation34_spill] sm:$0xff] %v2038_v11  ;;  %2992 = sst [smem:[#allocation45_spill]] %s2085_s20 }
  0xa3   : > { %v493_v25 = vmul.f32 %v491_v17, %v1788_v4  ;;  %v471_v26 = vadd.f32 %v469_v0, %v465_v18  ;;  %v472_v27 = vadd.f32 %v470_v7, %v466_v19  ;;  %v503_v29 = vstv %s1921_s11  ;;  %s2003_s11 = sld [smem:[#allocation11 + $0x1e]]  ;;  %v2046_v17 = vld [vmem:[#allocation2 + $0x1a] sm:$0xff]  ;;  %v2048_v18 = vld [vmem:[#allocation2 + $0x30] sm:$0xff]  ;;  %2996 = sst [smem:[#allocation49_spill]] %s2098_s29 }
  0xa4   : > { %v488_v30 = vadd.f32 %v487_v16, %v484_v22  ;;  %v489_v31 = vadd.f32 %v487_v16, %v485_v23  ;;  %v498_v32 = vmul.f32 %v497_v28, %v1795_v5  ;;  %v499_v33 = vmul.f32 %v497_v28, %v1798_v6  ;;  %2984 = vst [vmem:[#allocation37_spill] sm:$0xff] %v2046_v17  ;;  %v2080_v28 = vld [vmem:[#allocation2 + $0x48] sm:$0xff]  ;;  %2995 = sst [smem:[#allocation48_spill]] %s2096_s5  ;;  %s2125_s17 = sld [smem:[#allocation11 + $0x14]] }
  0xa5   : > { %v477_v34 = vadd.f32 %v475_v20, %v471_v26  ;;  %v478_v35 = vadd.f32 %v476_v21, %v472_v27  ;;  %v504_v36 = vmul.f32 %v503_v29, %v1801_v8  ;;  %v505_v37 = vmul.f32 %v503_v29, %v1804_v9  ;;  %2985 = vst [vmem:[#allocation38_spill] sm:$0xff] %v2048_v18  ;;  %v2055_v20 = vld [vmem:[#allocation2 + $0x31] sm:$0xff]  ;;  %3000 = sst [smem:[#allocation53_spill]] %s2112_s4 }
  0xa6   : > { %v494_v38 = vadd.f32 %v492_v24, %v488_v30  ;;  %v495_v39 = vadd.f32 %v493_v25, %v489_v31  ;;  %v512_v40 = vstv %s1935_s13  ;;  %v516_v41 = vstv %s1937_s14  ;;  %s2009_s13 = sld [smem:[#allocation11 + $0x21]]  ;;  %s2011_s14 = sld [smem:[#allocation11 + $0x24]]  ;;  %2986 = vst [vmem:[#allocation39_spill] sm:$0xff] %v2055_v20  ;;  %v2067_v24 = vld [vmem:[#allocation2 + $0x32] sm:$0xff]  ;;  %2991 = vst [vmem:[#allocation44_spill] sm:$0xff] %v2080_v28 }
  0xa7   : > { %480 = vst.msk [vmem:[#allocation2 + $0x79] sm:$0xff] %vm334_vm1, %v477_v34  ;;  %481 = vst.msk [vmem:[#allocation2 + $0x81] sm:$0xff] %vm334_vm1, %v478_v35  ;;  %v513_v42 = vmul.f32 %v512_v40, %v1775_v1  ;;  %v514_v43 = vmul.f32 %v512_v40, %v1778_v2  ;;  %v520_v44 = vstv %s1939_s15  ;;  %v526_v45 = vstv %s1941_s7  ;;  %s2021_s15 = sld [smem:[#allocation11 + $0x27]]  ;;  %s2023_s7 = sld [smem:[#allocation11 + $0x2a]]  ;;  %v2093_v34 = vld [vmem:[#allocation2 + $0x4a] sm:$0xff] }
  0xa8   : > { %v500_v46 = vadd.f32 %v498_v32, %v494_v38  ;;  %v501_v47 = vadd.f32 %v499_v33, %v495_v39  ;;  %v521_v48 = vmul.f32 %v520_v44, %v1785_v3  ;;  %v522_v49 = vmul.f32 %v520_v44, %v1788_v4  ;;  %v1997_v4 = vld [vmem:[#allocation2 + $0x1] sm:$0xff]  ;;  %2988 = vst [vmem:[#allocation41_spill] sm:$0xff] %v2067_v24  ;;  %v2090_v32 = vld [vmem:[#allocation2 + $0x49] sm:$0xff] }
  0xa9   : > { %v517_v50 = vadd.f32 %v516_v41, %v513_v42  ;;  %v518_v51 = vadd.f32 %v516_v41, %v514_v43  ;;  %v527_v1 = vmul.f32 %v526_v45, %v1795_v5  ;;  %v528_v2 = vmul.f32 %v526_v45, %v1798_v6  ;;  %2974 = sst [smem:[#allocation27_spill]] %s2003_s11  ;;  %2993 = vst [vmem:[#allocation46_spill] sm:$0xff] %v2090_v32  ;;  %v2106_v39 = vld [vmem:[#allocation2 + $0x61] sm:$0xff] }
  0xaa   : > { %v506_v53 = vadd.f32 %v504_v36, %v500_v46  ;;  %v507_v54 = vadd.f32 %v505_v37, %v501_v47  ;;  %v532_v55 = vstv %s1955_s6  ;;  %v543_v3 = vstv %s1957_s8  ;;  %s2031_s6 = sld [smem:[#allocation11 + $0x2d]]  ;;  %2994 = vst [vmem:[#allocation47_spill] sm:$0xff] %v2093_v34  ;;  %v2103_v37 = vld [vmem:[#allocation2 + $0x60] sm:$0xff]  ;;  %2998 = vst [vmem:[#allocation51_spill] sm:$0xff] %v2106_v39  ;;  %3004 = sst [smem:[#allocation57_spill]] %s2125_s17 }
  0xab   : > { %v523_v5 = vadd.f32 %v521_v48, %v517_v50  ;;  %v524_v6 = vadd.f32 %v522_v49, %v518_v51  ;;  %v533_v57 = vmul.f32 %v532_v55, %v1801_v8  ;;  %v534_v58 = vmul.f32 %v532_v55, %v1804_v9  ;;  %2997 = vst [vmem:[#allocation50_spill] sm:$0xff] %v2103_v37  ;;  %v2109_v41 = vld [vmem:[#allocation2 + $0x62] sm:$0xff]  ;;  %s3018_s8 = sld [smem:[#allocation27_spill]] }
  0xac   : > { %2975 = sst [smem:[#allocation28_spill]] %s2009_s13  ;;  %509 = vst.msk [vmem:[#allocation2 + $0x91] sm:$0xff] %vm334_vm1, %v506_v53  ;;  %510 = vst.msk [vmem:[#allocation2 + $0x99] sm:$0xff] %vm334_vm1, %v507_v54  ;;  %v544_v60 = vmul.f32 %v543_v3, %v1991_v52  ;;  %v563_v8 = vstv %s1961_s9  ;;  %v583_v61 = vstv %s1965_s10  ;;  %v2910_v62 = vstv %s1967_s12 }
  0xad   : > { %2976 = sst [smem:[#allocation29_spill]] %s2011_s14  ;;  %v529_v9 = vadd.f32 %v527_v1, %v523_v5  ;;  %v530_v63 = vadd.f32 %v528_v2, %v524_v6  ;;  %v564_v0 = vmul.f32 %v563_v8, %v1997_v4  ;;  %v584_v7 = vmul.f32 %v583_v61, %v1999_v56  ;;  %2999 = vst [vmem:[#allocation52_spill] sm:$0xff] %v2109_v41  ;;  %s3019_s9 = sld [smem:[#allocation28_spill]] }
  0xae   : > { %2977 = sst [smem:[#allocation30_spill]] %s2021_s15  ;;  %v604_v10 = vmul.f32 %v2910_v62, %v2007_v59  ;;  %v2908_v12 = vstv %s1973_s16  ;;  %v2907_v13 = vstv %s1975_s18  ;;  %v2898_v19 = vstv %s1983_s24  ;;  %v2117_v45 = vld [vmem:[#allocation2 + $0x78] sm:$0xff]  ;;  %s3021_s10 = sld [smem:[#allocation29_spill]] }
  0xaf   : > { %2978 = sst [smem:[#allocation31_spill]] %s2023_s7  ;;  %v535_v14 = vadd.f32 %v533_v57, %v529_v9  ;;  %v536_v15 = vadd.f32 %v534_v58, %v530_v63  ;;  %v566_v16 = vadd.f32 %v564_v0, %v544_v60  ;;  %v2897_v21 = vstv %s1987_s27  ;;  %3001 = vst [vmem:[#allocation54_spill] sm:$0xff] %v2117_v45  ;;  %v2120_v47 = vld [vmem:[#allocation2 + $0x79] sm:$0xff] }
  0xb0   : > { %2979 = sst [smem:[#allocation32_spill]] %s2031_s6  ;;  %v624_v23 = vmul.f32 %v2908_v12, %v2038_v11  ;;  %v2896_v25 = vstv %s1993_s25  ;;  %v644_v26 = vmul.f32 %v2907_v13, %v2046_v17  ;;  %v664_v27 = vmul.f32 %v2898_v19, %v2048_v18  ;;  %3002 = vst [vmem:[#allocation55_spill] sm:$0xff] %v2120_v47  ;;  %v2123_v49 = vld [vmem:[#allocation2 + $0x7a] sm:$0xff]  ;;  %v2382_v13 = vld [vmem:[#allocation2 + $0x22] sm:$0xff] }
  0xb1   : > { %538 = vst.msk [vmem:[#allocation2 + $0xa9] sm:$0xff] %vm334_vm1, %v535_v14  ;;  %539 = vst.msk [vmem:[#allocation2 + $0xb1] sm:$0xff] %vm334_vm1, %v536_v15  ;;  %v586_v22 = vadd.f32 %v584_v7, %v566_v16  ;;  %v2895_v29 = vstv %s2001_s30  ;;  %v684_v31 = vmul.f32 %v2897_v21, %v2055_v20  ;;  %v2892_v33 = vstv %s2003_s11  ;;  %s2158_s11 = sld [smem:[#allocation11 + $0x1a]]  ;;  %v2355_v12 = vld [vmem:[#allocation2 + $0x20] sm:$0xff] }
  0xb2   : > { %v2879_v35 = vstv %s2009_s13  ;;  %v704_v36 = vmul.f32 %v2896_v25, %v2067_v24  ;;  %v2875_v38 = vstv %s2011_s14  ;;  %v2873_v40 = vstv %s2021_s15  ;;  %3003 = vst [vmem:[#allocation56_spill] sm:$0xff] %v2123_v49  ;;  %s2156_s13 = sld [smem:[#allocation11 + $0x17]]  ;;  %s2212_s15 = sld [smem:[#allocation11 + $0x2c]] }
  0xb3   : > { %v606_v30 = vadd.f32 %v604_v10, %v586_v22  ;;  %v2872_v42 = vstv %s2023_s7  ;;  %v724_v44 = vmul.f32 %v2895_v29, %v2080_v28  ;;  %v2871_v46 = vstv %s2031_s6  ;;  %v2138_v2 = vld [vmem:[#allocation2 + $0x90] sm:$0xff]  ;;  %s2176_s7 = sld [smem:[#allocation11 + $0x1d]]  ;;  %s2187_s6 = sld [smem:[#allocation11 + $0x23]] }
  0xb4   : > { %v2865_v48 = vstv %s2033_s0  ;;  %v2130_v50 = vmul.f32 %v2892_v33, %v2090_v32  ;;  %v2135_v51 = vmul.f32 %v2879_v35, %v2093_v34  ;;  %v2864_v1 = vstv %s2042_s1  ;;  %3005 = vst [vmem:[#allocation58_spill] sm:$0xff] %v2138_v2  ;;  %s2185_s0 = sld [smem:[#allocation11 + $0x20]]  ;;  %s2195_s1 = sld [smem:[#allocation11 + $0x29]] }
  0xb5   : > { %v626_v43 = vadd.f32 %v624_v23, %v606_v30  ;;  %v2862_v53 = vstv %s2044_s2  ;;  %v2144_v55 = vmul.f32 %v2875_v38, %v2103_v37  ;;  %v2149_v5 = vmul.f32 %v2873_v40, %v2106_v39  ;;  %s2193_s2 = sld [smem:[#allocation11 + $0x26]]  ;;  %s2218_s14 = sld [smem:[#allocation11 + $0x2f]] }
  0xb6   : > { %v2154_v6 = vmul.f32 %v2872_v42, %v2109_v41  ;;  %v2163_v57 = vmul.f32 %v2871_v46, %v2117_v45  ;;  %v2168_v58 = vmul.f32 %v2865_v48, %v2120_v47  ;;  %v2173_v60 = vmul.f32 %v2864_v1, %v2123_v49 }
  0xb7   : > { %v646_v54 = vadd.f32 %v644_v26, %v626_v43  ;;  %v2878_v9 = vstv %s2051_s3  ;;  %v2181_v0 = vmul.f32 %v2862_v53, %v2138_v2  ;;  %v2880_v7 = vstv %s2053_s28  ;;  %v2197_v26 = vld [vmem:[#allocation2 + $0x91] sm:$0xff] }
  0xb8   : > { %v2881_v10 = vstv %s2058_s22  ;;  %v2890_v14 = vstv %s2060_s21  ;;  %v2869_v15 = vstv %s2072_s23  ;;  %v2868_v16 = vstv %s2083_s26  ;;  %3006 = vst [vmem:[#allocation59_spill] sm:$0xff] %v2197_v26  ;;  %v2201_v30 = vld [vmem:[#allocation2 + $0xa8] sm:$0xff]  ;;  %s2220_s23 = sld [smem:[#allocation11 + $0x32]]  ;;  %s2272_s22 = sld [smem:[#allocation11 + $0x3e]] }
  0xb9   : > { %v666_v63 = vadd.f32 %v664_v27, %v646_v54  ;;  %v2870_v22 = vstv %s2085_s20  ;;  %v2199_v27 = vld [vmem:[#allocation2 + $0x92] sm:$0xff]  ;;  %3008 = vst [vmem:[#allocation61_spill] sm:$0xff] %v2201_v30  ;;  %v556_v43 = vmul.f32 %v2869_v15, %v1991_v52  ;;  %v576_v54 = vmul.f32 %v2868_v16, %v1997_v4  ;;  %v2222_v15 = vld [vmem:[#allocation2 + $0xa9] sm:$0xff]  ;;  %s2230_s20 = sld [smem:[#allocation11 + $0x35]] }
  0xba   : > { %3007 = vst [vmem:[#allocation60_spill] sm:$0xff] %v2199_v27  ;;  %v596_v53 = vmul.f32 %v2870_v22, %v1999_v56  ;;  %v2882_v1 = vstv %s2098_s29  ;;  %v2889_v48 = vstv %s2112_s4  ;;  %3009 = vst [vmem:[#allocation62_spill] sm:$0xff] %v2222_v15  ;;  %v2224_v22 = vld [vmem:[#allocation2 + $0xaa] sm:$0xff]  ;;  %v2888_v40 = vstv %s2125_s17  ;;  %s2270_s29 = sld [smem:[#allocation11 + $0x3b]]  ;;  %s2277_s4 = sld [smem:[#allocation11 + $0x41]] }
  0xbb   : > { %v686_v23 = vadd.f32 %v684_v31, %v666_v63  ;;  %v2885_v31 = vstv %s2070_s19  ;;  %v2877_v63 = vstv %s2096_s5  ;;  %3010 = vst [vmem:[#allocation63_spill] sm:$0xff] %v2224_v22  ;;  %v578_v46 = vadd.f32 %v576_v54, %v556_v43  ;;  %s2250_s5 = sld [smem:[#allocation11 + $0x38]]  ;;  %s2279_s19 = sld [smem:[#allocation11 + $0x44]] }
  0xbc   : > { %v616_v42 = vmul.f32 %v2877_v63, %v2007_v59  ;;  %v2235_v38 = vmul.f32 %v2878_v9, %v2197_v26  ;;  %v636_v43 = vmul.f32 %v2882_v1, %v2038_v11  ;;  %v2893_v9 = vstv %s2156_s13  ;;  %s2289_s17 = sld [smem:[#allocation11 + $0x47]] }
  0xbd   : > { %v706_v16 = vadd.f32 %v704_v36, %v686_v23  ;;  %v2240_v36 = vmul.f32 %v2880_v7, %v2199_v27  ;;  %v2245_v23 = vmul.f32 %v2881_v10, %v2201_v30  ;;  %v598_v63 = vadd.f32 %v596_v53, %v578_v46 }
  0xbe   : > { %v2894_v35 = vstv %s2158_s11  ;;  %v2257_v7 = vmul.f32 %v2890_v14, %v2222_v15  ;;  %v2262_v10 = vmul.f32 %v2885_v31, %v2224_v22  ;;  %v656_v1 = vmul.f32 %v2889_v48, %v2046_v17 }
  0xbf   : > { %v726_v54 = vadd.f32 %v724_v44, %v706_v16  ;;  %v676_v44 = vmul.f32 %v2888_v40, %v2048_v18  ;;  %v618_v53 = vadd.f32 %v616_v42, %v598_v63  ;;  %v2904_v16 = vstv %s2176_s7 }
  0xc0   : > { %v2899_v31 = vstv %s2185_s0  ;;  %v696_v40 = vmul.f32 %v2893_v9, %v2055_v20  ;;  %v716_v48 = vmul.f32 %v2894_v35, %v2067_v24  ;;  %v2902_v14 = vstv %s2187_s6 }
  0xc1   : > { %v746_v46 = vadd.f32 %v2130_v50, %v726_v54  ;;  %v2900_v50 = vstv %s2193_s2  ;;  %v638_v63 = vadd.f32 %v636_v43, %v618_v53  ;;  %v2901_v54 = vstv %s2195_s1 }
  0xc2   : > { %v2903_v33 = vstv %s2212_s15  ;;  %v736_v9 = vmul.f32 %v2904_v16, %v2080_v28  ;;  %v756_v35 = vmul.f32 %v2899_v31, %v2090_v32  ;;  %v2905_v29 = vstv %s2218_s14 }
  0xc3   : > { %v766_v42 = vadd.f32 %v2135_v51, %v746_v46  ;;  %v2906_v25 = vstv %s2220_s23  ;;  %v658_v19 = vadd.f32 %v656_v1, %v638_v63  ;;  %v2306_v51 = vmul.f32 %v2902_v14, %v2093_v34  ;;  %v2309_v46 = vld [vmem:[#allocation2 + $0x8] sm:$0xff] }
  0xc4   : > { %v2909_v43 = vstv %s2230_s20  ;;  %v2314_v53 = vmul.f32 %v2900_v50, %v2103_v37  ;;  %v2319_v31 = vmul.f32 %v2901_v54, %v2106_v39  ;;  %v2324_v1 = vmul.f32 %v2903_v33, %v2109_v41  ;;  %v2338_v14 = vld [vmem:[#allocation2 + $0x9] sm:$0xff] }
  0xc5   : > { %v786_v21 = vadd.f32 %v2144_v55, %v766_v42  ;;  %v2911_v55 = vstv %s2250_s5  ;;  %v678_v63 = vadd.f32 %v676_v44, %v658_v19  ;;  %v2331_v50 = vmul.f32 %v2905_v29, %v2117_v45  ;;  %v2340_v33 = vld [vmem:[#allocation2 + $0xa] sm:$0xff]  ;;  %v2444_v34 = vld [vmem:[#allocation2 + $0x82] sm:$0xff] }
  0xc6   : > { %v2336_v54 = vmul.f32 %v2906_v25, %v2120_v47  ;;  %v2345_v16 = vmul.f32 %v2909_v43, %v2123_v49  ;;  %v2912_v19 = vstv %s2270_s29  ;;  %v2917_v25 = vstv %s2277_s4  ;;  %v2431_v45 = vld [vmem:[#allocation2 + $0x6a] sm:$0xff] }
  0xc7   : > { %v806_v42 = vadd.f32 %v2149_v5, %v786_v21  ;;  %v545_v5 = vmul.f32 %v543_v3, %v2309_v46  ;;  %v698_v29 = vadd.f32 %v696_v40, %v678_v63  ;;  %v2360_v43 = vmul.f32 %v2911_v55, %v2138_v2 }
  0xc8   : > { %v565_v21 = vmul.f32 %v563_v8, %v2338_v14  ;;  %v585_v3 = vmul.f32 %v583_v61, %v2340_v33  ;;  %v2375_v63 = vmul.f32 %v2912_v19, %v2197_v26  ;;  %v3011_v55 = vstv %s2272_s22  ;;  %v2384_v8 = vld [vmem:[#allocation2 + $0x38] sm:$0xff]  ;;  %v2403_v26 = vld [vmem:[#allocation2 + $0x50] sm:$0xff] }
  0xc9   : > { %v826_v44 = vadd.f32 %v2154_v6, %v806_v42  ;;  %v2369_v6 = vld [vmem:[#allocation2 + $0x21] sm:$0xff]  ;;  %v718_v42 = vadd.f32 %v716_v48, %v698_v29  ;;  %v2380_v62 = vmul.f32 %v3011_v55, %v2199_v27  ;;  %v2386_v61 = vld [vmem:[#allocation2 + $0x39] sm:$0xff]  ;;  %v3012_v29 = vstv %s2279_s19 }
  0xca   : > { %v2396_v48 = vmul.f32 %v3012_v29, %v2222_v15  ;;  %v3014_v55 = vstv %s1967_s12  ;;  %v2401_v27 = vld [vmem:[#allocation2 + $0x3a] sm:$0xff]  ;;  %v3017_v29 = vstv %s1973_s16  ;;  %s3024_s12 = sld [smem:[#allocation30_spill]]  ;;  %s3025_s16 = sld [smem:[#allocation31_spill]]  ;;  %v3031_v28 = vstv %s3018_s8 }
  0xcb   : > { %v846_v40 = vadd.f32 %v2163_v57, %v826_v44  ;;  %v2391_v57 = vmul.f32 %v2917_v25, %v2201_v30  ;;  %v567_v44 = vadd.f32 %v565_v21, %v545_v5  ;;  %v605_v19 = vmul.f32 %v3014_v55, %v2355_v12  ;;  %v2414_v21 = vld [vmem:[#allocation2 + $0x51] sm:$0xff]  ;;  %v2418_v55 = vld [vmem:[#allocation2 + $0x68] sm:$0xff]  ;;  %s3040_s8 = sld [smem:[#allocation45_spill]] }
  0xcc   : > { %3013 = vst [vmem:[#allocation64_spill] sm:$0xff] %v2396_v48  ;;  %v738_v49 = vadd.f32 %v736_v9, %v718_v42  ;;  %v3015_v25 = vstv %s2289_s17  ;;  %v625_v15 = vmul.f32 %v3017_v29, %v2369_v6  ;;  %v2416_v5 = vld [vmem:[#allocation2 + $0x52] sm:$0xff]  ;;  %v3023_v42 = vstv %s1987_s27  ;;  %v2429_v29 = vld [vmem:[#allocation2 + $0x69] sm:$0xff]  ;;  %s3030_s27 = sld [smem:[#allocation35_spill]]  ;;  %v2494_v48 = vld [vmem:[#allocation2 + $0x9a] sm:$0xff] }
  0xcd   : > { %v866_v2 = vadd.f32 %v2168_v58, %v846_v40  ;;  %v2409_v30 = vmul.f32 %v3015_v25, %v2224_v22  ;;  %v587_v47 = vadd.f32 %v585_v3, %v567_v44  ;;  %v3020_v58 = vstv %s1975_s18  ;;  %s3028_s18 = sld [smem:[#allocation32_spill]] }
  0xce   : > { %v645_v9 = vmul.f32 %v3020_v58, %v2382_v13  ;;  %v3022_v40 = vstv %s1983_s24  ;;  %v685_v22 = vmul.f32 %v3023_v42, %v2386_v61  ;;  %v758_v39 = vadd.f32 %v756_v35, %v738_v49  ;;  %s3029_s24 = sld [smem:[#allocation33_spill]]  ;;  %v2442_v42 = vld [vmem:[#allocation2 + $0x81] sm:$0xff] }
  0xcf   : > { %3016 = vst [vmem:[#allocation65_spill] sm:$0xff] %v2409_v30  ;;  %v665_v25 = vmul.f32 %v3022_v40, %v2384_v8  ;;  %v886_v41 = vadd.f32 %v2173_v60, %v866_v2  ;;  %v3026_v3 = vstv %s1993_s25  ;;  %v3027_v58 = vstv %s2001_s30  ;;  %v2440_v40 = vld [vmem:[#allocation2 + $0x80] sm:$0xff]  ;;  %s3034_s25 = sld [smem:[#allocation43_spill]]  ;;  %s3037_s30 = sld [smem:[#allocation36_spill]] }
  0xd0   : > { %v705_v44 = vmul.f32 %v3026_v3, %v2401_v27  ;;  %v725_v37 = vmul.f32 %v3027_v58, %v2403_v26  ;;  %v607_v32 = vadd.f32 %v605_v19, %v587_v47  ;;  %v2449_v2 = vmul.f32 %v3031_v28, %v2414_v21 }
  0xd1   : > { %v3032_v35 = vstv %s3019_s9  ;;  %v3033_v60 = vstv %s3021_s10  ;;  %v906_v58 = vadd.f32 %v2181_v0, %v886_v41  ;;  %v778_v24 = vadd.f32 %v2306_v51, %v758_v39  ;;  %s3048_s9 = sld [smem:[#allocation48_spill]]  ;;  %s3049_s10 = sld [smem:[#allocation40_spill]] }
  0xd2   : > { %v2454_v49 = vmul.f32 %v3032_v35, %v2416_v5  ;;  %v2459_v3 = vmul.f32 %v3033_v60, %v2418_v55  ;;  %v3035_v47 = vstv %s3024_s12  ;;  %v3036_v28 = vstv %s3025_s16  ;;  %v2473_v35 = vld [vmem:[#allocation2 + $0x98] sm:$0xff]  ;;  %s3058_s12 = sld [smem:[#allocation49_spill]]  ;;  %s3059_s16 = sld [smem:[#allocation42_spill]] }
  0xd3   : > { %v2466_v19 = vmul.f32 %v3035_v47, %v2429_v29  ;;  %v2471_v20 = vmul.f32 %v3036_v28, %v2431_v45  ;;  %3039 = vst [vmem:[#allocation67_spill] sm:$0xff] %v2473_v35  ;;  %v2475_v60 = vld [vmem:[#allocation2 + $0x99] sm:$0xff]  ;;  %v627_v18 = vadd.f32 %v625_v15, %v607_v32  ;;  %v3042_v41 = vstv %s3028_s18  ;;  %v2496_v32 = vld [vmem:[#allocation2 + $0xb0] sm:$0xff]  ;;  %s3061_s18 = sld [smem:[#allocation57_spill]] }
  0xd4   : > { %3041 = vst [vmem:[#allocation68_spill] sm:$0xff] %v2475_v60  ;;  %v2480_v0 = vmul.f32 %v3042_v41, %v2440_v40  ;;  %v3044_v39 = vstv %s3029_s24  ;;  %v3046_v47 = vstv %s3030_s27  ;;  %v926_v28 = vadd.f32 %v2235_v38, %v906_v58  ;;  %3050 = vst [vmem:[#allocation72_spill] sm:$0xff] %v2496_v32  ;;  %v2498_v15 = vld [vmem:[#allocation2 + $0xb1] sm:$0xff]  ;;  %s2543_s24 = sld [smem:[#allocation11 + $0x4]]  ;;  %s2677_s27 = sld [smem:[#allocation11 + $0x28]] }
  0xd5   : > { %3038 = vst [vmem:[#allocation66_spill] sm:$0xff] %v2471_v20  ;;  %v2485_v51 = vmul.f32 %v3044_v39, %v2442_v42  ;;  %v2490_v30 = vmul.f32 %v3046_v47, %v2444_v34  ;;  %v798_v17 = vadd.f32 %v2314_v53, %v778_v24  ;;  %3051 = vst [vmem:[#allocation73_spill] sm:$0xff] %v2498_v15  ;;  %v3052_v41 = vstv %s3034_s25  ;;  %s2681_s25 = sld [smem:[#allocation11 + $0x2b]] }
  0xd6   : > { %3043 = vst [vmem:[#allocation69_spill] sm:$0xff] %v2480_v0  ;;  %v557_v39 = vmul.f32 %v3052_v41, %v2309_v46  ;;  %v3053_v47 = vstv %s2083_s26  ;;  %v3054_v38 = vstv %s3037_s30  ;;  %v3055_v24 = vstv %s2051_s3  ;;  %s3060_s26 = sld [smem:[#allocation53_spill]]  ;;  %s2701_s30 = sld [smem:[#allocation11 + $0x2e]] }
  0xd7   : > { %3045 = vst [vmem:[#allocation70_spill] sm:$0xff] %v2485_v51  ;;  %3047 = vst [vmem:[#allocation71_spill] sm:$0xff] %v2490_v30  ;;  %v577_v30 = vmul.f32 %v3053_v47, %v2338_v14  ;;  %v647_v51 = vadd.f32 %v645_v9, %v627_v18  ;;  %v2509_v58 = vmul.f32 %v3054_v38, %v2473_v35  ;;  %v3057_v0 = vstv %s3040_s8  ;;  %v2521_v47 = vld [vmem:[#allocation2 + $0xb2] sm:$0xff]  ;;  %s2541_s3 = sld [smem:[#allocation11 + $0x1]]  ;;  %s2718_s8 = sld [smem:[#allocation11 + $0x34]] }
  0xd8   : > { %v2514_v53 = vmul.f32 %v3055_v24, %v2475_v60  ;;  %v597_v20 = vmul.f32 %v3057_v0, %v2340_v33  ;;  %v946_v11 = vadd.f32 %v2240_v36, %v926_v28  ;;  %v818_v41 = vadd.f32 %v2319_v31, %v798_v17 }
  0xd9   : > { %v579_v18 = vadd.f32 %v577_v30, %v557_v39  ;;  %v3062_v9 = vstv %s3048_s9  ;;  %v667_v35 = vadd.f32 %v665_v25, %v647_v51  ;;  %v3063_v24 = vstv %s2053_s28  ;;  %s2577_s28 = sld [smem:[#allocation11 + $0xa]]  ;;  %s2742_s9 = sld [smem:[#allocation11 + $0x3d]] }
  0xda   : > { %3056 = vst [vmem:[#allocation74_spill] sm:$0xff] %v2514_v53  ;;  %v617_v38 = vmul.f32 %v3062_v9, %v2355_v12  ;;  %v2529_v60 = vmul.f32 %v3063_v24, %v2494_v48  ;;  %v3064_v0 = vstv %s3049_s10  ;;  %v3065_v36 = vstv %s2060_s21  ;;  %s2561_s21 = sld [smem:[#allocation11 + $0x7]]  ;;  %s3114_s10 = sld [smem:[#allocation26_spill]] }
  0xdb   : > { %v2534_v53 = vmul.f32 %v3064_v0, %v2496_v32  ;;  %v2539_v17 = vmul.f32 %v3065_v36, %v2498_v15  ;;  %v966_v30 = vadd.f32 %v2245_v23, %v946_v11  ;;  %v838_v31 = vadd.f32 %v2324_v1, %v818_v41 }
  0xdc   : > { %v599_v25 = vadd.f32 %v597_v20, %v579_v18  ;;  %v3066_v51 = vstv %s3058_s12  ;;  %v687_v39 = vadd.f32 %v685_v22, %v667_v35  ;;  %v3067_v9 = vstv %s3059_s16  ;;  %s1031_s12 = sld [smem:[#allocation3]]  ;;  %s3119_s16 = sld [smem:[#allocation21_spill]] }
  0xdd   : > { %v637_v28 = vmul.f32 %v3066_v51, %v2369_v6  ;;  %v2553_v24 = vmul.f32 %v3067_v9, %v2521_v47  ;;  %v3068_v0 = vstv %s3060_s26  ;;  %v3069_v15 = vstv %s3061_s18 }
  0xde   : > { %v657_v36 = vmul.f32 %v3068_v0, %v2382_v13  ;;  %v677_v32 = vmul.f32 %v3069_v15, %v2384_v8  ;;  %v986_v11 = vadd.f32 %v2257_v7, %v966_v30  ;;  %v858_v20 = vadd.f32 %v2331_v50, %v838_v31 }
  0xdf   : > { %v619_v22 = vadd.f32 %v617_v38, %v599_v25  ;;  %v3070_v23 = vstv %s2156_s13  ;;  %v707_v35 = vadd.f32 %v705_v44, %v687_v39  ;;  %v3071_v41 = vstv %s2158_s11  ;;  %s1543_s11 = smov 1   ;;  %s2651_s13 = sld [smem:[#allocation11 + $0x1c]] }
  0xe0   : > { %v697_v1 = vmul.f32 %v3070_v23, %v2386_v61  ;;  %v717_v18 = vmul.f32 %v3071_v41, %v2401_v27  ;;  %v3072_v51 = vstv %s2176_s7  ;;  %v3073_v9 = vstv %s2185_s0  ;;  %s2601_s0 = sld [smem:[#allocation11 + $0xd]]  ;;  %s1184_s26 = sshll.u32 %s3114_s10, 4 }
  0xe1   : > { %v737_v15 = vmul.f32 %v3072_v51, %v2403_v26  ;;  %v757_v0 = vmul.f32 %v3073_v9, %v2414_v21  ;;  %v1006_v7 = vadd.f32 %v2262_v10, %v986_v11  ;;  %v878_v50 = vadd.f32 %v2336_v54, %v858_v20  ;;  %s2668_s7 = sld [smem:[#allocation11 + $0x25]]  ;;  %s282_s18 = scalar_lea.vmem [#allocation12], %s1184_s26 }
  0xe2   : > { %v639_v44 = vadd.f32 %v637_v28, %v619_v22  ;;  %v3074_v38 = vstv %s2187_s6  ;;  %v727_v31 = vadd.f32 %v725_v37, %v707_v35  ;;  %v3075_v25 = vstv %s2193_s2  ;;  %s2632_s2 = sld [smem:[#allocation11 + $0x13]]  ;;  %s1544_s6 = smov 127  }
  0xe3   : > { %v2584_v30 = vmul.f32 %v3074_v38, %v2416_v5  ;;  %v2589_v39 = vmul.f32 %v3075_v25, %v2418_v55  ;;  %v3076_v23 = vstv %s2195_s1  ;;  %v3077_v10 = vstv %s2212_s15  ;;  %1022 = vrot.lane.b32.xlu0 %v1006_v7, %s1543_s11  ;;  %s2623_s1 = sld [smem:[#allocation11 + $0x10]]  ;;  %s2662_s15 = sld [smem:[#allocation11 + $0x22]] }
  0xe4   : > { %v2594_v41 = vmul.f32 %v3076_v23, %v2429_v29  ;;  %v2599_v11 = vmul.f32 %v3077_v10, %v2431_v45  ;;  %v898_v54 = vadd.f32 %v2345_v16, %v878_v50  ;;  %v659_v37 = vadd.f32 %v657_v36, %v639_v44 }
  0xe5   : > { %v3078_v28 = vstv %s2218_s14  ;;  %v3079_v22 = vstv %s2220_s23  ;;  %v747_v51 = vadd.f32 %v2449_v2, %v727_v31  ;;  %v3080_v9 = vstv %s2230_s20  ;;  %s2639_s20 = sld [smem:[#allocation11 + $0x16]]  ;;  %s2644_s23 = sld [smem:[#allocation11 + $0x19]] }
  0xe6   : > { %v2608_v20 = vmul.f32 %v3078_v28, %v2440_v40  ;;  %v2613_v35 = vmul.f32 %v3079_v22, %v2442_v42  ;;  %v2619_v38 = vmul.f32 %v3080_v9, %v2444_v34  ;;  %v549_v25 = vstv %s2541_s3  ;;  %s2653_s14 = sld [smem:[#allocation11 + $0x1f]] }
  0xe7   : > { %v569_v7 = vstv %s2543_s24  ;;  %v918_v16 = vadd.f32 %v2360_v43, %v898_v54  ;;  %v679_v36 = vadd.f32 %v677_v32, %v659_v37  ;;  %v550_v50 = vmul.f32 %v549_v25, %v1991_v52  ;;  %s1300_s24 = sshll.u32 %s3119_s16, 8 }
  0xe8   : > { %v551_v44 = vmul.f32 %v549_v25, %v2309_v46  ;;  %v767_v23 = vadd.f32 %v2454_v49, %v747_v51  ;;  %v570_v2 = vmul.f32 %v569_v7, %v1997_v4  ;;  %v571_v31 = vmul.f32 %v569_v7, %v2338_v14  ;;  %v3081_v25 = vld [vmem:[#allocation34_spill] sm:$0xff] }
  0xe9   : > { %v589_v10 = vstv %s2561_s21  ;;  %v938_v28 = vadd.f32 %v2375_v63, %v918_v16  ;;  %v699_v22 = vadd.f32 %v697_v1, %v679_v36  ;;  %v609_v49 = vstv %s2577_s28  ;;  %v3083_v36 = vld [vmem:[#allocation64_spill] sm:$0xff]  ;;  %s1066_s21 = sshll.u32 %s282_s18, 4  ;;  %s2788_s21 = int_to_ptr.vmem [resolvable:$true] %s1066_s21 }
  0xea   : > { %v590_v43 = vmul.f32 %v589_v10, %v1999_v56  ;;  %v591_v32 = vmul.f32 %v589_v10, %v2340_v33  ;;  %v787_v52 = vadd.f32 %v2459_v3, %v767_v23  ;;  %v572_v46 = vadd.f32 %v570_v2, %v550_v50  ;;  %v3084_v23 = vld [vmem:[#allocation37_spill] sm:$0xff] }
  0xeb   : > { %v573_v54 = vadd.f32 %v571_v31, %v551_v44  ;;  %v958_v4 = vadd.f32 %v2380_v62, %v938_v28  ;;  %v719_v14 = vadd.f32 %v717_v18, %v699_v22  ;;  %v610_v37 = vmul.f32 %v609_v49, %v2007_v59  ;;  %v3082_v59 = vld [vmem:[#allocation66_spill] sm:$0xff]  ;;  %v3085_v2 = vld [vmem:[#allocation69_spill] sm:$0xff] }
  0xec   : > { %v611_v63 = vmul.f32 %v609_v49, %v2355_v12  ;;  %v807_v56 = vadd.f32 %v2466_v19, %v787_v52  ;;  %v592_v33 = vadd.f32 %v590_v43, %v572_v46  ;;  %v629_v3 = vstv %s2601_s0  ;;  %v3086_v22 = vld [vmem:[#allocation65_spill] sm:$0xff]  ;;  %v3087_v52 = vld [vmem:[#allocation38_spill] sm:$0xff] }
  0xed   : > { %v593_v1 = vadd.f32 %v591_v32, %v573_v54  ;;  %v978_v51 = vadd.f32 %v2391_v57, %v958_v4  ;;  %v739_v9 = vadd.f32 %v737_v15, %v719_v14  ;;  %v630_v7 = vmul.f32 %v629_v3, %v3081_v25  ;;  %v3088_v54 = vld [vmem:[#allocation70_spill] sm:$0xff] }
  0xee   : > { %v631_v62 = vmul.f32 %v629_v3, %v2369_v6  ;;  %v827_v12 = vadd.f32 %v3082_v59, %v807_v56  ;;  %v612_v18 = vadd.f32 %v610_v37, %v592_v33  ;;  %v649_v19 = vstv %s2623_s1 }
  0xef   : > { %v613_v16 = vadd.f32 %v611_v63, %v593_v1  ;;  %v998_v50 = vadd.f32 %v3083_v36, %v978_v51  ;;  %v759_v44 = vadd.f32 %v757_v0, %v739_v9  ;;  %v650_v57 = vmul.f32 %v649_v19, %v3084_v23  ;;  %v3089_v63 = vld [vmem:[#allocation39_spill] sm:$0xff]  ;;  %v3091_v9 = vld [vmem:[#allocation41_spill] sm:$0xff] }
  0xf0   : > { %v651_v15 = vmul.f32 %v649_v19, %v2382_v13  ;;  %v847_v31 = vadd.f32 %v3085_v2, %v827_v12  ;;  %v632_v6 = vadd.f32 %v630_v7, %v612_v18  ;;  %v669_v28 = vstv %s2632_s2  ;;  %s1053_s2 = scalar_lea.sflag [#allocation6], %s3114_s10 }
  0xf1   : > { %v633_v10 = vadd.f32 %v631_v62, %v613_v16  ;;  %v1018_v43 = vadd.f32 %v3086_v22, %v998_v50  ;;  %v779_v32 = vadd.f32 %v2584_v30, %v759_v44  ;;  %v670_v46 = vmul.f32 %v669_v28, %v3087_v52  ;;  %v3092_v16 = vld [vmem:[#allocation44_spill] sm:$0xff]  ;;  %v3093_v44 = vld [vmem:[#allocation46_spill] sm:$0xff]  ;;  %v3097_v22 = vld [vmem:[#allocation47_spill] sm:$0xff] }
  0xf2   : > { %v671_v0 = vmul.f32 %v669_v28, %v2384_v8  ;;  %v867_v13 = vadd.f32 %v3088_v54, %v847_v31  ;;  %v652_v49 = vadd.f32 %v650_v57, %v632_v6  ;;  %v689_v14 = vstv %s2639_s20  ;;  %v3090_v8 = vld [vmem:[#allocation71_spill] sm:$0xff]  ;;  %v3094_v57 = vld [vmem:[#allocation74_spill] sm:$0xff]  ;;  %s1460_s20 = scalar_lea.vmem %s2788_s21, 256 }
  0xf3   : > { %v653_v4 = vadd.f32 %v651_v15, %v633_v10  ;;  %1039 = vrot.lane.b32.xlu1 %v1018_v43, %s1544_s6  ;;  %v799_v37 = vadd.f32 %v2589_v39, %v779_v32  ;;  %v690_v30 = vmul.f32 %v689_v14, %v3089_v63  ;;  %v691_v56 = vmul.f32 %v689_v14, %v2386_v61  ;;  %v3095_v6 = vld [vmem:[#allocation67_spill] sm:$0xff]  ;;  %v3099_v63 = vld [vmem:[#allocation68_spill] sm:$0xff]  ;;  %p1461_p12 = scmp.ne.s32.totalorder %s2788_s21, %s1460_s20 }
  0xf4   : > { %v709_v33 = vstv %s2644_s23  ;;  %v887_v1 = vadd.f32 %v3090_v8, %v867_v13  ;;  %v672_v3 = vadd.f32 %v670_v46, %v652_v49  ;;  %v729_v62 = vstv %s2651_s13  ;;  %s1545_s23 = smov [#allocation12]  }
  0xf5   : > { %v673_v51 = vadd.f32 %v671_v0, %v653_v4  ;;  %v710_v25 = vmul.f32 %v709_v33, %v3091_v9  ;;  %v819_v7 = vadd.f32 %v2594_v41, %v799_v37  ;;  %v711_v39 = vmul.f32 %v709_v33, %v2401_v27  ;;  %v3098_v0 = vld [vmem:[#allocation50_spill] sm:$0xff]  ;;  %p1462_p0 = pnand %p1461_p12, %p1682_p9  ;;  %s1464_s13 = sshll.u32 %s1545_s23, 4  ;;  %s1465_s13 = int_to_ptr.vmem [resolvable:$false] %s1464_s13 }
  0xf6   : > { %v749_v59 = vstv %s2653_s14  ;;  %v907_v61 = vadd.f32 %v2509_v58, %v887_v1  ;;  %v692_v12 = vadd.f32 %v690_v30, %v672_v3  ;;  %v730_v19 = vmul.f32 %v729_v62, %v3092_v16  ;;  %s1466_s14 = scalar_lea.vmem %s1465_s13, 512  ;;  %p1467_p2 = scmp.lt.s32.totalorder %s2788_s21, %s1465_s13 }
  0xf7   : > { %v693_v18 = vadd.f32 %v691_v56, %v673_v51  ;;  %v839_v36 = vadd.f32 %v2599_v11, %v819_v7  ;;  %v731_v50 = vmul.f32 %v729_v62, %v2403_v26  ;;  %v750_v23 = vmul.f32 %v749_v59, %v3093_v44  ;;  %v3101_v56 = vld [vmem:[#allocation51_spill] sm:$0xff]  ;;  %p1463_p3 = pneg %p1462_p0  ;;  %p1468_p4 = scmp.lt.s32.totalorder %s1466_s14, %s1460_s20 }
  0xf8   : > { %v751_v41 = vmul.f32 %v749_v59, %v2414_v21  ;;  %v927_v27 = vadd.f32 %v3094_v57, %v907_v61  ;;  %v712_v15 = vadd.f32 %v710_v25, %v692_v12  ;;  %v769_v31 = vstv %s2662_s15  ;;  %v3104_v59 = vld [vmem:[#allocation72_spill] sm:$0xff] }
  0xf9   : > { %v713_v2 = vadd.f32 %v711_v39, %v693_v18  ;;  %v859_v58 = vadd.f32 %v2608_v20, %v839_v36  ;;  %v3096_v10 = vstv %s2250_s5  ;;  %v770_v11 = vmul.f32 %v769_v31, %v3097_v22  ;;  %s2709_s5 = sld [smem:[#allocation11 + $0x31]]  ;;  %v3106_v36 = vld [vmem:[#allocation73_spill] sm:$0xff]  ;;  %p1469_p6 = por %p1468_p4, %p1467_p2 }
  0xfa   : > { %v917_v28 = vmul.f32 %v3096_v10, %v3095_v6  ;;  %v789_v43 = vstv %s2668_s7  ;;  %v947_v26 = vadd.f32 %v2529_v60, %v927_v27  ;;  %v732_v21 = vadd.f32 %v730_v19, %v712_v15 }
  0xfb   : > { %v733_v32 = vadd.f32 %v731_v50, %v713_v2  ;;  %v771_v52 = vmul.f32 %v769_v31, %v2416_v5  ;;  %v879_v46 = vadd.f32 %v2613_v35, %v859_v58  ;;  %v790_v20 = vmul.f32 %v789_v43, %v3098_v0  ;;  %p1470_p8 = pnand %p1469_p6, %p1463_p3 }
  0xfc   : > { %v791_v54 = vmul.f32 %v789_v43, %v2418_v55  ;;  %v809_v13 = vstv %s2677_s27  ;;  %v967_v49 = vadd.f32 %v2534_v53, %v947_v26  ;;  %v752_v4 = vadd.f32 %v750_v23, %v732_v21 }
  0xfd   : > { %v753_v14 = vadd.f32 %v751_v41, %v733_v32  ;;  %v829_v37 = vstv %s2681_s25  ;;  %v899_v60 = vadd.f32 %v2619_v38, %v879_v46  ;;  %v3100_v30 = vstv %s2270_s29  ;;  %v3103_v38 = vld [vmem:[#allocation52_spill] sm:$0xff]  ;;  %s2726_s29 = sld [smem:[#allocation11 + $0x37]] }
  0xfe   : > { %v937_v5 = vmul.f32 %v3100_v30, %v3099_v63  ;;  %v810_v35 = vmul.f32 %v809_v13, %v3101_v56  ;;  %v987_v55 = vadd.f32 %v2539_v17, %v967_v49  ;;  %v772_v33 = vadd.f32 %v770_v11, %v752_v4  ;;  %v3110_v56 = vld [vmem:[#allocation55_spill] sm:$0xff] }
  0xff   : > { %v773_v8 = vadd.f32 %v771_v52, %v753_v14  ;;  %v811_v53 = vmul.f32 %v809_v13, %v2429_v29  ;;  %v919_v1 = vadd.f32 %v917_v28, %v899_v60  ;;  %v3102_v3 = vstv %s2272_s22  ;;  %s2734_s22 = sld [smem:[#allocation11 + $0x3a]] }
 0x100   : > { %v957_v51 = vmul.f32 %v3102_v3, %v2494_v48  ;;  %v830_v9 = vmul.f32 %v829_v37, %v3103_v38  ;;  %v1007_v25 = vadd.f32 %v2553_v24, %v987_v55  ;;  %v792_v7 = vadd.f32 %v790_v20, %v772_v33  ;;  %v3111_v55 = vld [vmem:[#allocation56_spill] sm:$0xff] }
 0x101   : > { %v793_v39 = vadd.f32 %v791_v54, %v773_v8  ;;  %v831_v17 = vmul.f32 %v829_v37, %v2431_v45  ;;  %v939_v62 = vadd.f32 %v937_v5, %v919_v1  ;;  %v3105_v61 = vstv %s2277_s4  ;;  %s2749_s4 = sld [smem:[#allocation11 + $0x40]] }
 0x102   : > { %v977_v29 = vmul.f32 %v3105_v61, %v3104_v59  ;;  %v849_v12 = vstv %s2701_s30  ;;  %1024 = vrot.lane.b32.xlu0 %v1007_v25, %s1543_s11  ;;  %v812_v18 = vadd.f32 %v810_v35, %v792_v7  ;;  %v3107_v50 = vstv %s2279_s19  ;;  %s2753_s19 = sld [smem:[#allocation11 + $0x43]]  ;;  %v3115_v25 = vld [vmem:[#allocation60_spill] sm:$0xff]  ;;  %s3121_s11 = sld [smem:[#allocation79_spill]] }
 0x103   : > { %v813_v16 = vadd.f32 %v811_v53, %v793_v39  ;;  %v851_v24 = vmul.f32 %v849_v12, %v2440_v40  ;;  %v959_v19 = vadd.f32 %v957_v51, %v939_v62  ;;  %v997_v45 = vmul.f32 %v3107_v50, %v3106_v36  ;;  %v3112_v53 = vld [vmem:[#allocation58_spill] sm:$0xff]  ;;  %v3113_v51 = vld [vmem:[#allocation59_spill] sm:$0xff]  ;;  %v3116_v39 = vld [vmem:[#allocation61_spill] sm:$0xff] }
 0x104   : > { %v869_v44 = vstv %s2709_s5  ;;  %v832_v23 = vadd.f32 %v830_v9, %v812_v18  ;;  %v3108_v15 = vstv %s2289_s17  ;;  %v889_v31 = vstv %s2718_s8  ;;  %s2757_s17 = sld [smem:[#allocation11 + $0x46]]  ;;  %v3118_v18 = vld [vmem:[#allocation63_spill] sm:$0xff] }
 0x105   : > { %v833_v41 = vadd.f32 %v831_v17, %v813_v16  ;;  %v871_v57 = vmul.f32 %v869_v44, %v2442_v42  ;;  %v979_v27 = vadd.f32 %v977_v29, %v959_v19  ;;  %v1017_v2 = vmul.f32 %v3108_v15, %v2521_v47 }
 0x106   : > { %v891_v58 = vmul.f32 %v889_v31, %v2444_v34  ;;  %v909_v28 = vstv %s2726_s29  ;;  %v929_v43 = vstv %s2734_s22  ;;  %v949_v32 = vstv %s2742_s9 }
 0x107   : > { %v853_v40 = vadd.f32 %v851_v24, %v833_v41  ;;  %v999_v10 = vadd.f32 %v997_v45, %v979_v27  ;;  %v911_v42 = vmul.f32 %v909_v28, %v3095_v6  ;;  %v931_v21 = vmul.f32 %v929_v43, %v3099_v63  ;;  %v3109_v63 = vld [vmem:[#allocation54_spill] sm:$0xff] }
 0x108   : > { %v951_v52 = vmul.f32 %v949_v32, %v2494_v48  ;;  %v969_v46 = vstv %s2749_s4  ;;  %v989_v54 = vstv %s2753_s19  ;;  %v850_v30 = vmul.f32 %v849_v12, %v3109_v63  ;;  %s2786_s1 = scalar_lea.hbm %s3121_s11, %s1300_s24 }
 0x109   : > { %v873_v22 = vadd.f32 %v871_v57, %v853_v40  ;;  %v1019_v11 = vadd.f32 %v1017_v2, %v999_v10  ;;  %v971_v20 = vmul.f32 %v969_v46, %v3104_v59  ;;  %v991_v13 = vmul.f32 %v989_v54, %v3106_v36  ;;  %v3117_v59 = vld [vmem:[#allocation62_spill] sm:$0xff] }
 0x10a   : > { %v1009_v49 = vstv %s2757_s17  ;;  %v852_v5 = vadd.f32 %v850_v30, %v832_v23  ;;  %v870_v35 = vmul.f32 %v869_v44, %v3110_v56  ;;  %v890_v33 = vmul.f32 %v889_v31, %v3111_v55 }
 0x10b   : > { %v893_v26 = vadd.f32 %v891_v58, %v873_v22  ;;  %1041 = vrot.lane.b32.xlu1 %v1019_v11, %s1544_s6  ;;  %v1011_v14 = vmul.f32 %v1009_v49, %v2521_v47  ;;  %v910_v1 = vmul.f32 %v909_v28, %v3112_v53  ;;  %v930_v38 = vmul.f32 %v929_v43, %v3113_v51 }
 0x10c   : > { %v872_v48 = vadd.f32 %v870_v35, %v852_v5  ;;  %v950_v47 = vmul.f32 %v949_v32, %v3115_v25  ;;  %v970_v17 = vmul.f32 %v969_v46, %v3116_v39  ;;  %v990_v61 = vmul.f32 %v989_v54, %v3117_v59 }
 0x10d   : > { %v913_v34 = vadd.f32 %v911_v42, %v893_v26  ;;  %vm1028_vm2 = vcmask 7168   ;;  %v1010_v16 = vmul.f32 %v1009_v49, %v3118_v18  ;;  %v1032_v19 = vstv %s1031_s12 }
 0x10e   : > { %v892_v8 = vadd.f32 %v890_v33, %v872_v48  ;;  %vm1045_vm3 = vcmask 121856  }
 0x10f   : > { %v933_v0 = vadd.f32 %v931_v21, %v913_v34 }
 0x110   : > { %v912_v3 = vadd.f32 %v910_v1, %v892_v8 }
 0x111   : > { %v953_v6 = vadd.f32 %v951_v52, %v933_v0 }
 0x112   : > { %v932_v9 = vadd.f32 %v930_v38, %v912_v3 }
 0x113   : > { %v973_v4 = vadd.f32 %v971_v20, %v953_v6 }
 0x114   : > { %v952_v7 = vadd.f32 %v950_v47, %v932_v9 }
 0x115   : > { %v993_v37 = vadd.f32 %v991_v13, %v973_v4 }
 0x116   : > { %v972_v62 = vadd.f32 %v970_v17, %v952_v7 }
 0x117   : > { %v1013_v60 = vadd.f32 %v1011_v14, %v993_v37 }
 0x118   : > { %v992_v12 = vadd.f32 %v990_v61, %v972_v62 }
 0x11a   : > { %v1012_v36 = vadd.f32 %v1010_v16, %v992_v12 }
 0x155   : > { %v1023_v29 = vpop.permute.xlu0 %1022 }
 0x156   : > { %v1029_v24 = vsel %vm1028_vm2, 0.0, %v1023_v29 }
 0x157   : > { %v1033_v50 = vadd.f32 %v1032_v19, %v1029_v24 }
 0x159   : > { %v1035_v45 = vadd.f32 %v1033_v50, %v1012_v36 }
 0x165   : > { %v1040_v44 = vpop.permute.xlu1 %1039 }
 0x166   : > { %v1046_v23 = vsel %vm1045_vm3, %v1040_v44, 0.0 }
 0x167   : > { %v1048_v41 = vadd.f32 %v1046_v23, %v1035_v45 }
 0x169   : > { %1050 = vst.msk [vmem:[%s282_s18] sm:$0xff] %vm334_vm1, %v1048_v41 }
 0x174   : > { %v1025_v57 = vpop.permute.xlu0 %1024 }
 0x175   : > { %v1030_v27 = vsel %vm1028_vm2, 0.0, %v1025_v57 }
 0x176   : > { %v1034_v15 = vadd.f32 %v1032_v19, %v1030_v27 }
 0x178   : > { %v1036_v2 = vadd.f32 %v1034_v15, %v1013_v60 }
 0x17d   : > { %v1042_v31 = vpop.permute.xlu1 %1041 }
 0x17e   : > { %v1047_v40 = vsel %vm1045_vm3, %v1042_v31, 0.0 }
 0x17f   : > { %v1049_v58 = vadd.f32 %v1047_v40, %v1036_v2 }
 0x181   : > { %1051 = vst.msk [vmem:[%s282_s18 + $0x8] sm:$0xff] %vm334_vm1, %v1049_v58 }
 0x182   : > { %1473 = shalt.err (!%p1470_p8)
}
 0x183   : > { %s1474_s15 = scalar_lea.hbm %s2786_s1, 256  ;;  %s1478_s27 = scalar_lea.hbm %s3121_s11, 512 }
 0x184   : > { %p1475_p1 = scmp.ne.s32.totalorder %s2786_s1, %s1474_s15  ;;  %p1479_p13 = scmp.lt.u32.totalorder %s2786_s1, %s3121_s11 }
 0x185   : > { %p1480_p7 = scmp.lt.u32.totalorder %s1478_s27, %s1474_s15  ;;  %p1482_p12 = scmp.lt.u32.totalorder %s1474_s15, %s2786_s1 }
 0x186   : > { %p1476_p5 = pnand %p1475_p1, %p1682_p9 }
 0x187   : > { %p1481_p10 = por %p1480_p7, %p1479_p13 }
 0x188   : > { %p1477_p11 = pneg %p1476_p5 }
 0x189   : > { %p1483_p0 = por %p1482_p12, %p1481_p10 }
 0x18b   : > { %p1484_p3 = pnand %p1483_p0, %p1477_p11 }
 0x18d   : > { %1487 = shalt.err (!%p1484_p3)
}
 0x18e   : > { %s1546_s5 = smov 128   ;;  %s1547_s8 = smov 8  }
 0x18f   : > { %1315 = dma.vmem_to_hbm [thread:$0]  (%p1682_p9), %s2788_s21, 256, %s2786_s1, %s1053_s2, %s1546_s5, %s1546_s5, %s1547_s8  }
 0x190 PF: > { %s3122_s29 = sld [smem:[#allocation17_spill]]  ;;  %s3123_s22 = sld [smem:[#allocation22_spill]] }
 0x191   : > { %s3124_s9 = sld [smem:[#allocation20_spill]] }
 0x196   : > { %s1081_s4 = sand.u32 1, %s3122_s29   ;;  %p3125_p2 = scmp.ne.s32.totalorder %s3123_s22, 0 }
 0x197   : > { %p3126_p4 = scmp.ge.s32.totalorder %s3124_s9, 2  ;;  %s1082_s19 = scalar_lea.sflag [#allocation6], %s1081_s4 }
 0x199   : > { %p1332_p6 = pnand %p3126_p4, %p3125_p2 }
 0x19b   : > { %1517 = dma.done.wait (!%p1332_p6), %s1082_s19, 256  }
 0x19c   : > { %1519 = vsyncadd (!%p1332_p6), %s1082_s19, 4294967040  ;;  %s3127_s23 = sld [smem:[#allocation23_spill]]  ;;  %s3128_s20 = sld [smem:[#allocation18_spill]] }
 0x19d   : > { %s3129_s21 = sld [smem:[#allocation19_spill]]  ;;  %s3130_s22 = sld [smem:[#allocation24_spill]] }
 0x1a2   : > { %p21_p8 = scmp.ge.s32.totalorder %s3127_s23, 4  }
 0x1a4   :  { %23 = sbr.rel (!%p21_p8) target bundleno = 14 (0xe), region = 105 }
 0x1ab   :  { %1087 = vsyncpa [#allocation5], 1 }
 0x1ac   :  { %1089 = vsyncpa [#allocation5 + $0x1], 1 }
 0x1ad   :  { %1090 = vsyncpa [#allocation6], 1 }
 0x1ae   :  { %1092 = vsyncpa [#allocation6 + $0x1], 1 }
 0x1af   :  { %1093 = vsyncpa [#allocation7], 1 }
 0x1b0   :  { %1095 = vsyncpa [#allocation7 + $0x1], 1 }
 0x1b1   :  { %1096 = vsyncpa [#allocation10], 1 }

</bundles_post_ra>
